<compile_context>
chip_gen: v7x
topology: tpu7x:2x2x1
jax: 0.10.0
libtpu: 0.0.40
codegen_flags: <defaults>
</compile_context>

<pallas_src>
import functools

import jax
import jax.numpy as jnp
from jax.experimental import pallas as pl
from jax.experimental.pallas import tpu as pltpu

_LANE = 128
_SUBLANE = 8


def _round_up(n, m):
    return ((n + m - 1) // m) * m


# ----------------------------------------------------------------------------
# Kernel
# ----------------------------------------------------------------------------
def encoder_kernel(
    x_ref,
    w1_ref, b1_ref,
    w2_ref, b2_ref,
    w3_ref, b3_ref,
    w4_ref, b4_ref,
    wmv_ref, bmv_ref,        # fused [H4p, 2*Lp] bf16 weight / [1, 2*Lp] f32 bias
    eps_ref,
    latent_ref, mean_ref, logvar_ref,
    *, latent_pad,
):
    def dense_relu(h_f32, w_ref, b_ref):
        # bf16 operands on the MXU, f32 accumulation; bias + ReLU in f32 (VPU).
        acc = jnp.dot(h_f32.astype(jnp.bfloat16), w_ref[...],
                      preferred_element_type=jnp.float32) + b_ref[...]
        return jnp.maximum(acc, 0.0)

    h = dense_relu(x_ref[...], w1_ref, b1_ref)
    h = dense_relu(h, w2_ref, b2_ref)
    h = dense_relu(h, w3_ref, b3_ref)
    h = dense_relu(h, w4_ref, b4_ref)

    # Fused mean/logvar head: one matmul, lane-aligned split at latent_pad
    # (latent_pad is a multiple of 128, so no relayout).
    heads = jnp.dot(h.astype(jnp.bfloat16), wmv_ref[...],
                    preferred_element_type=jnp.float32) + bmv_ref[...]
    mean = heads[:, :latent_pad]
    logvar = heads[:, latent_pad:]

    # Reparameterization: latent = eps * exp(0.5 * logvar) + mean   (all f32)
    std = jnp.exp(0.5 * logvar)
    latent = eps_ref[...] * std + mean

    latent_ref[...] = latent.astype(latent_ref.dtype)
    mean_ref[...] = mean.astype(mean_ref.dtype)
    logvar_ref[...] = logvar.astype(logvar_ref.dtype)


# ----------------------------------------------------------------------------
# Parameter preparation (done once): pad to 128 lanes, fuse heads, cast to bf16
# ----------------------------------------------------------------------------
def prepare_packed_params(params):
    def pad2(a, rows, cols):
        return jnp.pad(a, ((0, rows - a.shape[0]), (0, cols - a.shape[1])))

    In, H1 = params["w1"].shape
    H2 = params["w2"].shape[1]
    H3 = params["w3"].shape[1]
    H4 = params["w4"].shape[1]
    L = params["wm"].shape[1]

    Inp = _round_up(In, _LANE)
    H1p, H2p, H3p, H4p = (_round_up(h, _LANE) for h in (H1, H2, H3, H4))
    Lp = _round_up(L, _LANE)

    packed = {
        "w1": pad2(params["w1"], Inp, H1p).astype(jnp.bfloat16),
        "b1": pad2(params["b1"], 1, H1p),
        "w2": pad2(params["w2"], H1p, H2p).astype(jnp.bfloat16),
        "b2": pad2(params["b2"], 1, H2p),
        "w3": pad2(params["w3"], H2p, H3p).astype(jnp.bfloat16),
        "b3": pad2(params["b3"], 1, H3p),
        "w4": pad2(params["w4"], H3p, H4p).astype(jnp.bfloat16),
        "b4": pad2(params["b4"], 1, H4p),
        # fused [H4p, 2*Lp] head: mean lanes [0:Lp), logvar lanes [Lp:2Lp)
        "wmv": jnp.concatenate(
            [pad2(params["wm"], H4p, Lp), pad2(params["wv"], H4p, Lp)],
            axis=1).astype(jnp.bfloat16),
        "bmv": jnp.concatenate(
            [pad2(params["bm"], 1, Lp), pad2(params["bv"], 1, Lp)], axis=1),
        "meta": {
            "in": In, "in_pad": Inp,
            "latent": L, "latent_pad": Lp,
            "hidden_pad": (H1p, H2p, H3p, H4p),
        },
    }
    return packed


# ----------------------------------------------------------------------------
# Forward wrapper
# ----------------------------------------------------------------------------
def encoder_forward(x, packed, eps, *, block_batch=512):
    """x: [B, input_size] f32, eps: [B, latent_length] f32 standard normal.
    Returns (latent, mean, logvar), each [B, latent_length] f32."""
    B, In = x.shape
    meta = packed["meta"]
    Inp, Lp, L = meta["in_pad"], meta["latent_pad"], meta["latent"]
    H1p, H2p, H3p, H4p = meta["hidden_pad"]
    assert In == meta["in"], "input feature size mismatch with packed params"

    # Batch tile: multiple of 8 sublanes, capped at block_batch; force >= 2
    # grid steps (when possible) so both v7x TensorCores get work.
    TB = min(block_batch, _round_up(B, _SUBLANE))
    Bp = _round_up(B, TB)
    if Bp // TB < 2 and TB > _SUBLANE:
        TB = _round_up(TB // 2, _SUBLANE)
        Bp = _round_up(B, TB)
    num_blocks = Bp // TB

    x_p = jnp.pad(x, ((0, Bp - B), (0, Inp - In)))
    eps_p = jnp.pad(eps, ((0, Bp - B), (0, Lp - L)))

    weights = (
        packed["w1"], packed["b1"],
        packed["w2"], packed["b2"],
        packed["w3"], packed["b3"],
        packed["w4"], packed["b4"],
        packed["wmv"], packed["bmv"],
    )
    param_bytes = sum(int(w.size) * w.dtype.itemsize for w in weights)

    cost = pl.CostEstimate(
        flops=int(2 * Bp * (Inp * H1p + H1p * H2p + H2p * H3p + H3p * H4p
                            + H4p * 2 * Lp)),
        transcendentals=int(Bp * Lp),
        bytes_accessed=int(4 * Bp * (Inp + Lp + 3 * Lp) + param_bytes),
    )

    def build(single_buffer_params):
        def const_spec(arr):
            # Resident parameters: constant block index -> DMA'd once; with
            # Buffered(1) they also only occupy 1x their size in VMEM.
            kwargs = {}
            if single_buffer_params:
                kwargs["pipeline_mode"] = pl.Buffered(1)
            return pl.BlockSpec(arr.shape, lambda i: (0, 0), **kwargs)

        in_specs = (
            [pl.BlockSpec((TB, Inp), lambda i: (i, 0))]      # x tile
            + [const_spec(w) for w in weights]               # resident params
            + [pl.BlockSpec((TB, Lp), lambda i: (i, 0))]     # eps tile
        )
        out_specs = tuple(pl.BlockSpec((TB, Lp), lambda i: (i, 0))
                          for _ in range(3))

        param_buffers = 1 if single_buffer_params else 2
        vmem_bytes = (
            param_bytes * param_buffers
            + 2 * TB * Inp * 4          # double-buffered x tiles
            + 2 * TB * Lp * 4           # double-buffered eps tiles
            + 3 * 2 * TB * Lp * 4       # double-buffered output tiles
        )
        vmem_limit = int(min(max(vmem_bytes + (8 << 20), 16 << 20), 64 << 20))

        return pl.pallas_call(
            functools.partial(encoder_kernel, latent_pad=Lp),
            out_shape=tuple(jax.ShapeDtypeStruct((Bp, Lp), jnp.float32)
                            for _ in range(3)),
            grid=(num_blocks,),
            in_specs=in_specs,
            out_specs=out_specs,
            compiler_params=pltpu.CompilerParams(
                dimension_semantics=("parallel",),
                vmem_limit_bytes=vmem_limit,
            ),
            cost_estimate=cost,
        )

    try:
        latent_p, mean_p, logvar_p = build(True)(x_p, *weights, eps_p)
    except Exception:
        # Fallback if pipeline_mode=pl.Buffered(1) is unsupported on this jax
        # version: default double buffering of the resident params.
        latent_p, mean_p, logvar_p = build(False)(x_p, *weights, eps_p)

    return (latent_p[:B, :L], mean_p[:B, :L], logvar_p[:B, :L])


# ----------------------------------------------------------------------------
# Parameter init (mirrors PyTorch defaults + the module's xavier heads)
# ----------------------------------------------------------------------------
def _kaiming_uniform(key, fan_in, fan_out):
    # PyTorch default Linear init: kaiming_uniform(a=sqrt(5)) -> bound=1/sqrt(fan_in)
    bound = (1.0 / fan_in) ** 0.5
    return jax.random.uniform(key, (fan_in, fan_out), jnp.float32,
                              minval=-bound, maxval=bound)


def _xavier_uniform(key, fan_in, fan_out):
    bound = (6.0 / (fan_in + fan_out)) ** 0.5
    return jax.random.uniform(key, (fan_in, fan_out), jnp.float32,
                              minval=-bound, maxval=bound)


def make_params(key, input_size, hidden1, hidden2, hidden3, hidden4, latent_length):
    keys = jax.random.split(key, 12)

    def bias(k, fan_in, out):
        b = (1.0 / fan_in) ** 0.5
        return jax.random.uniform(k, (1, out), jnp.float32, minval=-b, maxval=b)

    return {
        "w1": _kaiming_uniform(keys[0], input_size, hidden1),
        "b1": bias(keys[1], input_size, hidden1),
        "w2": _kaiming_uniform(keys[2], hidden1, hidden2),
        "b2": bias(keys[3], hidden1, hidden2),
        "w3": _kaiming_uniform(keys[4], hidden2, hidden3),
        "b3": bias(keys[5], hidden2, hidden3),
        "w4": _kaiming_uniform(keys[6], hidden3, hidden4),
        "b4": bias(keys[7], hidden3, hidden4),
        "wm": _xavier_uniform(keys[8], hidden4, latent_length),
        "bm": bias(keys[9], hidden4, latent_length),
        "wv": _xavier_uniform(keys[10], hidden4, latent_length),
        "bv": bias(keys[11], hidden4, latent_length),
    }


# ----------------------------------------------------------------------------
# Pure-JAX reference (mirrors the kernel's bf16-operand / f32-accum math)
# ----------------------------------------------------------------------------
def encoder_reference(x, params, eps):
    def dense(h, w, b):
        return jnp.dot(h.astype(jnp.bfloat16), w.astype(jnp.bfloat16),
                       preferred_element_type=jnp.float32) + b

    h = x
    for i in (1, 2, 3, 4):
        h = jnp.maximum(dense(h, params[f"w{i}"], params[f"b{i}"]), 0.0)
    mean = dense(h, params["wm"], params["bm"])
    logvar = dense(h, params["wv"], params["bv"])
    std = jnp.exp(0.5 * logvar)
    latent = eps * std + mean
    return latent, mean, logvar


if __name__ == "__main__":
    # Small deterministic shapes consistent with the module's forward.
    batch = 16
    input_size = 32
    hidden1 = hidden2 = hidden3 = hidden4 = 32
    latent_length = 16

    key = jax.random.PRNGKey(0)
    k_params, k_x, k_eps = jax.random.split(key, 3)

    params = make_params(
        k_params, input_size, hidden1, hidden2, hidden3, hidden4, latent_length
    )
    packed = prepare_packed_params(params)   # hoisted out of the forward call

    x = jax.random.normal(k_x, (batch, input_size), jnp.float32)
    # torch.randn_like(std) equivalent (deterministic glue).
    eps = jax.random.normal(k_eps, (batch, latent_length), jnp.float32)

    latent, mean, logvar = jax.block_until_ready(
        encoder_forward(x, packed, eps)
    )

    ref_latent, ref_mean, ref_logvar = encoder_reference(x, params, eps)
    assert jnp.allclose(latent, ref_latent, atol=1e-3, rtol=1e-3)
    assert jnp.allclose(mean, ref_mean, atol=1e-3, rtol=1e-3)
    assert jnp.allclose(logvar, ref_logvar, atol=1e-3, rtol=1e-3)

    print("KERNEL_OK")
</pallas_src>

<mosaic_0001>
module attributes {stable_mosaic.version = 11 : i64} {
  func.func @encoder_kernel(%arg0: i32, %arg1: memref<8x128xf32, #tpu.memory_space<vmem>>, %arg2: memref<128x128xbf16, #tpu.memory_space<vmem>>, %arg3: memref<1x128xf32, #tpu.memory_space<vmem>>, %arg4: memref<128x128xbf16, #tpu.memory_space<vmem>>, %arg5: memref<1x128xf32, #tpu.memory_space<vmem>>, %arg6: memref<128x128xbf16, #tpu.memory_space<vmem>>, %arg7: memref<1x128xf32, #tpu.memory_space<vmem>>, %arg8: memref<128x128xbf16, #tpu.memory_space<vmem>>, %arg9: memref<1x128xf32, #tpu.memory_space<vmem>>, %arg10: memref<128x256xbf16, #tpu.memory_space<vmem>>, %arg11: memref<1x256xf32, #tpu.memory_space<vmem>>, %arg12: memref<8x128xf32, #tpu.memory_space<vmem>>, %arg13: memref<8x128xf32, #tpu.memory_space<vmem>>, %arg14: memref<8x128xf32, #tpu.memory_space<vmem>>, %arg15: memref<8x128xf32, #tpu.memory_space<vmem>>) attributes {dimension_semantics = [#tpu.dimension_semantics<parallel>], iteration_bounds = array<i64: 2>, scalar_prefetch = 0 : i64, scratch_operands = 0 : i64, tpu.core_type = #tpu.core_type<tc>, window_params = [{transform_indices = @transform_0, window_bounds = array<i64: 8, 128>}, {pipeline_mode = #tpu.pipeline_mode<synchronous>, transform_indices = @transform_1, window_bounds = array<i64: 128, 128>}, {pipeline_mode = #tpu.pipeline_mode<synchronous>, transform_indices = @transform_2, window_bounds = array<i64: 1, 128>}, {pipeline_mode = #tpu.pipeline_mode<synchronous>, transform_indices = @transform_3, window_bounds = array<i64: 128, 128>}, {pipeline_mode = #tpu.pipeline_mode<synchronous>, transform_indices = @transform_4, window_bounds = array<i64: 1, 128>}, {pipeline_mode = #tpu.pipeline_mode<synchronous>, transform_indices = @transform_5, window_bounds = array<i64: 128, 128>}, {pipeline_mode = #tpu.pipeline_mode<synchronous>, transform_indices = @transform_6, window_bounds = array<i64: 1, 128>}, {pipeline_mode = #tpu.pipeline_mode<synchronous>, transform_indices = @transform_7, window_bounds = array<i64: 128, 128>}, {pipeline_mode = #tpu.pipeline_mode<synchronous>, transform_indices = @transform_8, window_bounds = array<i64: 1, 128>}, {pipeline_mode = #tpu.pipeline_mode<synchronous>, transform_indices = @transform_9, window_bounds = array<i64: 128, 256>}, {pipeline_mode = #tpu.pipeline_mode<synchronous>, transform_indices = @transform_10, window_bounds = array<i64: 1, 256>}, {transform_indices = @transform_11, window_bounds = array<i64: 8, 128>}, {transform_indices = @transform_12, window_bounds = array<i64: 8, 128>}, {transform_indices = @transform_13, window_bounds = array<i64: 8, 128>}, {transform_indices = @transform_14, window_bounds = array<i64: 8, 128>}]} {
    %c0 = arith.constant 0 : index
    %c0_0 = arith.constant 0 : index
    %0 = vector.load %arg1[%c0, %c0_0] : memref<8x128xf32, #tpu.memory_space<vmem>>, vector<8x128xf32>
    %1 = arith.truncf %0 : vector<8x128xf32> to vector<8x128xbf16>
    %c0_1 = arith.constant 0 : index
    %c0_2 = arith.constant 0 : index
    %2 = vector.load %arg2[%c0_1, %c0_2] : memref<128x128xbf16, #tpu.memory_space<vmem>>, vector<128x128xbf16>
    %cst = arith.constant dense<0.000000e+00> : vector<8x128xf32>
    %3 = tpu.matmul %1, %2, %cst {dimension_numbers = #tpu.dot_dimension_numbers<[1], [0], [0], [1], [0, 0, 1, 1], [], []>} : vector<8x128xbf16>, vector<128x128xbf16>, vector<8x128xf32> -> vector<8x128xf32>
    %c0_3 = arith.constant 0 : index
    %c0_4 = arith.constant 0 : index
    %4 = vector.load %arg3[%c0_3, %c0_4] : memref<1x128xf32, #tpu.memory_space<vmem>>, vector<1x128xf32>
    %5 = vector.broadcast %4 : vector<1x128xf32> to vector<8x128xf32>
    %6 = arith.addf %3, %5 : vector<8x128xf32>
    %cst_5 = arith.constant 0.000000e+00 : f32
    %7 = vector.broadcast %cst_5 : f32 to vector<8x128xf32>
    %8 = arith.maximumf %6, %7 : vector<8x128xf32>
    %9 = arith.truncf %8 : vector<8x128xf32> to vector<8x128xbf16>
    %c0_6 = arith.constant 0 : index
    %c0_7 = arith.constant 0 : index
    %10 = vector.load %arg4[%c0_6, %c0_7] : memref<128x128xbf16, #tpu.memory_space<vmem>>, vector<128x128xbf16>
    %cst_8 = arith.constant dense<0.000000e+00> : vector<8x128xf32>
    %11 = tpu.matmul %9, %10, %cst_8 {dimension_numbers = #tpu.dot_dimension_numbers<[1], [0], [0], [1], [0, 0, 1, 1], [], []>} : vector<8x128xbf16>, vector<128x128xbf16>, vector<8x128xf32> -> vector<8x128xf32>
    %c0_9 = arith.constant 0 : index
    %c0_10 = arith.constant 0 : index
    %12 = vector.load %arg5[%c0_9, %c0_10] : memref<1x128xf32, #tpu.memory_space<vmem>>, vector<1x128xf32>
    %13 = vector.broadcast %12 : vector<1x128xf32> to vector<8x128xf32>
    %14 = arith.addf %11, %13 : vector<8x128xf32>
    %cst_11 = arith.constant 0.000000e+00 : f32
    %15 = vector.broadcast %cst_11 : f32 to vector<8x128xf32>
    %16 = arith.maximumf %14, %15 : vector<8x128xf32>
    %17 = arith.truncf %16 : vector<8x128xf32> to vector<8x128xbf16>
    %c0_12 = arith.constant 0 : index
    %c0_13 = arith.constant 0 : index
    %18 = vector.load %arg6[%c0_12, %c0_13] : memref<128x128xbf16, #tpu.memory_space<vmem>>, vector<128x128xbf16>
    %cst_14 = arith.constant dense<0.000000e+00> : vector<8x128xf32>
    %19 = tpu.matmul %17, %18, %cst_14 {dimension_numbers = #tpu.dot_dimension_numbers<[1], [0], [0], [1], [0, 0, 1, 1], [], []>} : vector<8x128xbf16>, vector<128x128xbf16>, vector<8x128xf32> -> vector<8x128xf32>
    %c0_15 = arith.constant 0 : index
    %c0_16 = arith.constant 0 : index
    %20 = vector.load %arg7[%c0_15, %c0_16] : memref<1x128xf32, #tpu.memory_space<vmem>>, vector<1x128xf32>
    %21 = vector.broadcast %20 : vector<1x128xf32> to vector<8x128xf32>
    %22 = arith.addf %19, %21 : vector<8x128xf32>
    %cst_17 = arith.constant 0.000000e+00 : f32
    %23 = vector.broadcast %cst_17 : f32 to vector<8x128xf32>
    %24 = arith.maximumf %22, %23 : vector<8x128xf32>
    %25 = arith.truncf %24 : vector<8x128xf32> to vector<8x128xbf16>
    %c0_18 = arith.constant 0 : index
    %c0_19 = arith.constant 0 : index
    %26 = vector.load %arg8[%c0_18, %c0_19] : memref<128x128xbf16, #tpu.memory_space<vmem>>, vector<128x128xbf16>
    %cst_20 = arith.constant dense<0.000000e+00> : vector<8x128xf32>
    %27 = tpu.matmul %25, %26, %cst_20 {dimension_numbers = #tpu.dot_dimension_numbers<[1], [0], [0], [1], [0, 0, 1, 1], [], []>} : vector<8x128xbf16>, vector<128x128xbf16>, vector<8x128xf32> -> vector<8x128xf32>
    %c0_21 = arith.constant 0 : index
    %c0_22 = arith.constant 0 : index
    %28 = vector.load %arg9[%c0_21, %c0_22] : memref<1x128xf32, #tpu.memory_space<vmem>>, vector<1x128xf32>
    %29 = vector.broadcast %28 : vector<1x128xf32> to vector<8x128xf32>
    %30 = arith.addf %27, %29 : vector<8x128xf32>
    %cst_23 = arith.constant 0.000000e+00 : f32
    %31 = vector.broadcast %cst_23 : f32 to vector<8x128xf32>
    %32 = arith.maximumf %30, %31 : vector<8x128xf32>
    %33 = arith.truncf %32 : vector<8x128xf32> to vector<8x128xbf16>
    %c0_24 = arith.constant 0 : index
    %c0_25 = arith.constant 0 : index
    %34 = vector.load %arg10[%c0_24, %c0_25] : memref<128x256xbf16, #tpu.memory_space<vmem>>, vector<128x256xbf16>
    %cst_26 = arith.constant dense<0.000000e+00> : vector<8x256xf32>
    %35 = tpu.matmul %33, %34, %cst_26 {dimension_numbers = #tpu.dot_dimension_numbers<[1], [0], [0], [1], [0, 0, 1, 1], [], []>} : vector<8x128xbf16>, vector<128x256xbf16>, vector<8x256xf32> -> vector<8x256xf32>
    %c0_27 = arith.constant 0 : index
    %c0_28 = arith.constant 0 : index
    %36 = vector.load %arg11[%c0_27, %c0_28] : memref<1x256xf32, #tpu.memory_space<vmem>>, vector<1x256xf32>
    %37 = vector.broadcast %36 : vector<1x256xf32> to vector<8x256xf32>
    %38 = arith.addf %35, %37 : vector<8x256xf32>
    %39 = vector.extract_strided_slice %38 {offsets = [0, 0], sizes = [8, 128], strides = [1, 1]} : vector<8x256xf32> to vector<8x128xf32>
    %40 = vector.extract_strided_slice %38 {offsets = [0, 128], sizes = [8, 128], strides = [1, 1]} : vector<8x256xf32> to vector<8x128xf32>
    %cst_29 = arith.constant 5.000000e-01 : f32
    %41 = vector.broadcast %cst_29 : f32 to vector<8x128xf32>
    %42 = arith.mulf %41, %40 : vector<8x128xf32>
    %43 = math.exp %42 : vector<8x128xf32>
    %c0_30 = arith.constant 0 : index
    %c0_31 = arith.constant 0 : index
    %44 = vector.load %arg12[%c0_30, %c0_31] : memref<8x128xf32, #tpu.memory_space<vmem>>, vector<8x128xf32>
    %45 = arith.mulf %44, %43 : vector<8x128xf32>
    %46 = arith.addf %45, %39 : vector<8x128xf32>
    %c0_32 = arith.constant 0 : index
    %c0_33 = arith.constant 0 : index
    %47 = vector.load %arg13[%c0_32, %c0_33] : memref<8x128xf32, #tpu.memory_space<vmem>>, vector<8x128xf32>
    tpu.vector_store %arg13[%c0_32, %c0_33], %46 {strides = array<i32>} : memref<8x128xf32, #tpu.memory_space<vmem>>, vector<8x128xf32>,
    %c0_34 = arith.constant 0 : index
    %c0_35 = arith.constant 0 : index
    %48 = vector.load %arg14[%c0_34, %c0_35] : memref<8x128xf32, #tpu.memory_space<vmem>>, vector<8x128xf32>
    tpu.vector_store %arg14[%c0_34, %c0_35], %39 {strides = array<i32>} : memref<8x128xf32, #tpu.memory_space<vmem>>, vector<8x128xf32>,
    %c0_36 = arith.constant 0 : index
    %c0_37 = arith.constant 0 : index
    %49 = vector.load %arg15[%c0_36, %c0_37] : memref<8x128xf32, #tpu.memory_space<vmem>>, vector<8x128xf32>
    tpu.vector_store %arg15[%c0_36, %c0_37], %40 {strides = array<i32>} : memref<8x128xf32, #tpu.memory_space<vmem>>, vector<8x128xf32>,
    return
  }
  func.func @transform_0(%arg0: i32) -> (i32, i32) {
    %c0_i32 = arith.constant 0 : i32
    %c0_i32_0 = arith.constant 0 : i32
    return %arg0, %c0_i32 : i32, i32
  }
  func.func @transform_1(%arg0: i32) -> (i32, i32) {
    %c0_i32 = arith.constant 0 : i32
    %c0_i32_0 = arith.constant 0 : i32
    %c0_i32_1 = arith.constant 0 : i32
    return %c0_i32, %c0_i32_0 : i32, i32
  }
  func.func @transform_2(%arg0: i32) -> (i32, i32) {
    %c0_i32 = arith.constant 0 : i32
    %c0_i32_0 = arith.constant 0 : i32
    %c0_i32_1 = arith.constant 0 : i32
    return %c0_i32, %c0_i32_0 : i32, i32
  }
  func.func @transform_3(%arg0: i32) -> (i32, i32) {
    %c0_i32 = arith.constant 0 : i32
    %c0_i32_0 = arith.constant 0 : i32
    %c0_i32_1 = arith.constant 0 : i32
    return %c0_i32, %c0_i32_0 : i32, i32
  }
  func.func @transform_4(%arg0: i32) -> (i32, i32) {
    %c0_i32 = arith.constant 0 : i32
    %c0_i32_0 = arith.constant 0 : i32
    %c0_i32_1 = arith.constant 0 : i32
    return %c0_i32, %c0_i32_0 : i32, i32
  }
  func.func @transform_5(%arg0: i32) -> (i32, i32) {
    %c0_i32 = arith.constant 0 : i32
    %c0_i32_0 = arith.constant 0 : i32
    %c0_i32_1 = arith.constant 0 : i32
    return %c0_i32, %c0_i32_0 : i32, i32
  }
  func.func @transform_6(%arg0: i32) -> (i32, i32) {
    %c0_i32 = arith.constant 0 : i32
    %c0_i32_0 = arith.constant 0 : i32
    %c0_i32_1 = arith.constant 0 : i32
    return %c0_i32, %c0_i32_0 : i32, i32
  }
  func.func @transform_7(%arg0: i32) -> (i32, i32) {
    %c0_i32 = arith.constant 0 : i32
    %c0_i32_0 = arith.constant 0 : i32
    %c0_i32_1 = arith.constant 0 : i32
    return %c0_i32, %c0_i32_0 : i32, i32
  }
  func.func @transform_8(%arg0: i32) -> (i32, i32) {
    %c0_i32 = arith.constant 0 : i32
    %c0_i32_0 = arith.constant 0 : i32
    %c0_i32_1 = arith.constant 0 : i32
    return %c0_i32, %c0_i32_0 : i32, i32
  }
  func.func @transform_9(%arg0: i32) -> (i32, i32) {
    %c0_i32 = arith.constant 0 : i32
    %c0_i32_0 = arith.constant 0 : i32
    %c0_i32_1 = arith.constant 0 : i32
    return %c0_i32, %c0_i32_0 : i32, i32
  }
  func.func @transform_10(%arg0: i32) -> (i32, i32) {
    %c0_i32 = arith.constant 0 : i32
    %c0_i32_0 = arith.constant 0 : i32
    %c0_i32_1 = arith.constant 0 : i32
    return %c0_i32, %c0_i32_0 : i32, i32
  }
  func.func @transform_11(%arg0: i32) -> (i32, i32) {
    %c0_i32 = arith.constant 0 : i32
    %c0_i32_0 = arith.constant 0 : i32
    return %arg0, %c0_i32 : i32, i32
  }
  func.func @transform_12(%arg0: i32) -> (i32, i32) {
    %c0_i32 = arith.constant 0 : i32
    %c0_i32_0 = arith.constant 0 : i32
    return %arg0, %c0_i32 : i32, i32
  }
  func.func @transform_13(%arg0: i32) -> (i32, i32) {
    %c0_i32 = arith.constant 0 : i32
    %c0_i32_0 = arith.constant 0 : i32
    return %arg0, %c0_i32 : i32, i32
  }
  func.func @transform_14(%arg0: i32) -> (i32, i32) {
    %c0_i32 = arith.constant 0 : i32
    %c0_i32_0 = arith.constant 0 : i32
    return %arg0, %c0_i32 : i32, i32
  }
}

module attributes {stable_mosaic.version = 11 : i64} {
  func.func @encoder_kernel(%arg0: i32, %arg1: memref<8x128xf32, #tpu.memory_space<vmem>>, %arg2: memref<128x128xbf16, #tpu.memory_space<vmem>>, %arg3: memref<1x128xf32, #tpu.memory_space<vmem>>, %arg4: memref<128x128xbf16, #tpu.memory_space<vmem>>, %arg5: memref<1x128xf32, #tpu.memory_space<vmem>>, %arg6: memref<128x128xbf16, #tpu.memory_space<vmem>>, %arg7: memref<1x128xf32, #tpu.memory_space<vmem>>, %arg8: memref<128x128xbf16, #tpu.memory_space<vmem>>, %arg9: memref<1x128xf32, #tpu.memory_space<vmem>>, %arg10: memref<128x256xbf16, #tpu.memory_space<vmem>>, %arg11: memref<1x256xf32, #tpu.memory_space<vmem>>, %arg12: memref<8x128xf32, #tpu.memory_space<vmem>>, %arg13: memref<8x128xf32, #tpu.memory_space<vmem>>, %arg14: memref<8x128xf32, #tpu.memory_space<vmem>>, %arg15: memref<8x128xf32, #tpu.memory_space<vmem>>) attributes {dimension_semantics = [#tpu.dimension_semantics<parallel>], iteration_bounds = array<i64: 2>, scalar_prefetch = 0 : i64, scratch_operands = 0 : i64, tpu.core_type = #tpu.core_type<tc>, window_params = [{transform_indices = @transform_0, window_bounds = array<i64: 8, 128>}, {pipeline_mode = #tpu.pipeline_mode<synchronous>, transform_indices = @transform_1, window_bounds = array<i64: 128, 128>}, {pipeline_mode = #tpu.pipeline_mode<synchronous>, transform_indices = @transform_2, window_bounds = array<i64: 1, 128>}, {pipeline_mode = #tpu.pipeline_mode<synchronous>, transform_indices = @transform_3, window_bounds = array<i64: 128, 128>}, {pipeline_mode = #tpu.pipeline_mode<synchronous>, transform_indices = @transform_4, window_bounds = array<i64: 1, 128>}, {pipeline_mode = #tpu.pipeline_mode<synchronous>, transform_indices = @transform_5, window_bounds = array<i64: 128, 128>}, {pipeline_mode = #tpu.pipeline_mode<synchronous>, transform_indices = @transform_6, window_bounds = array<i64: 1, 128>}, {pipeline_mode = #tpu.pipeline_mode<synchronous>, transform_indices = @transform_7, window_bounds = array<i64: 128, 128>}, {pipeline_mode = #tpu.pipeline_mode<synchronous>, transform_indices = @transform_8, window_bounds = array<i64: 1, 128>}, {pipeline_mode = #tpu.pipeline_mode<synchronous>, transform_indices = @transform_9, window_bounds = array<i64: 128, 256>}, {pipeline_mode = #tpu.pipeline_mode<synchronous>, transform_indices = @transform_10, window_bounds = array<i64: 1, 256>}, {transform_indices = @transform_11, window_bounds = array<i64: 8, 128>}, {transform_indices = @transform_12, window_bounds = array<i64: 8, 128>}, {transform_indices = @transform_13, window_bounds = array<i64: 8, 128>}, {transform_indices = @transform_14, window_bounds = array<i64: 8, 128>}]} {
    %c0 = arith.constant 0 : index
    %c0_0 = arith.constant 0 : index
    %0 = vector.load %arg1[%c0, %c0_0] : memref<8x128xf32, #tpu.memory_space<vmem>>, vector<8x128xf32>
    %1 = arith.truncf %0 : vector<8x128xf32> to vector<8x128xbf16>
    %c0_1 = arith.constant 0 : index
    %c0_2 = arith.constant 0 : index
    %2 = vector.load %arg2[%c0_1, %c0_2] : memref<128x128xbf16, #tpu.memory_space<vmem>>, vector<128x128xbf16>
    %cst = arith.constant dense<0.000000e+00> : vector<8x128xf32>
    %3 = tpu.matmul %1, %2, %cst {dimension_numbers = #tpu.dot_dimension_numbers<[1], [0], [0], [1], [0, 0, 1, 1], [], []>} : vector<8x128xbf16>, vector<128x128xbf16>, vector<8x128xf32> -> vector<8x128xf32>
    %c0_3 = arith.constant 0 : index
    %c0_4 = arith.constant 0 : index
    %4 = vector.load %arg3[%c0_3, %c0_4] : memref<1x128xf32, #tpu.memory_space<vmem>>, vector<1x128xf32>
    %5 = vector.broadcast %4 : vector<1x128xf32> to vector<8x128xf32>
    %6 = arith.addf %3, %5 : vector<8x128xf32>
    %cst_5 = arith.constant 0.000000e+00 : f32
    %7 = vector.broadcast %cst_5 : f32 to vector<8x128xf32>
    %8 = arith.maximumf %6, %7 : vector<8x128xf32>
    %9 = arith.truncf %8 : vector<8x128xf32> to vector<8x128xbf16>
    %c0_6 = arith.constant 0 : index
    %c0_7 = arith.constant 0 : index
    %10 = vector.load %arg4[%c0_6, %c0_7] : memref<128x128xbf16, #tpu.memory_space<vmem>>, vector<128x128xbf16>
    %cst_8 = arith.constant dense<0.000000e+00> : vector<8x128xf32>
    %11 = tpu.matmul %9, %10, %cst_8 {dimension_numbers = #tpu.dot_dimension_numbers<[1], [0], [0], [1], [0, 0, 1, 1], [], []>} : vector<8x128xbf16>, vector<128x128xbf16>, vector<8x128xf32> -> vector<8x128xf32>
    %c0_9 = arith.constant 0 : index
    %c0_10 = arith.constant 0 : index
    %12 = vector.load %arg5[%c0_9, %c0_10] : memref<1x128xf32, #tpu.memory_space<vmem>>, vector<1x128xf32>
    %13 = vector.broadcast %12 : vector<1x128xf32> to vector<8x128xf32>
    %14 = arith.addf %11, %13 : vector<8x128xf32>
    %cst_11 = arith.constant 0.000000e+00 : f32
    %15 = vector.broadcast %cst_11 : f32 to vector<8x128xf32>
    %16 = arith.maximumf %14, %15 : vector<8x128xf32>
    %17 = arith.truncf %16 : vector<8x128xf32> to vector<8x128xbf16>
    %c0_12 = arith.constant 0 : index
    %c0_13 = arith.constant 0 : index
    %18 = vector.load %arg6[%c0_12, %c0_13] : memref<128x128xbf16, #tpu.memory_space<vmem>>, vector<128x128xbf16>
    %cst_14 = arith.constant dense<0.000000e+00> : vector<8x128xf32>
    %19 = tpu.matmul %17, %18, %cst_14 {dimension_numbers = #tpu.dot_dimension_numbers<[1], [0], [0], [1], [0, 0, 1, 1], [], []>} : vector<8x128xbf16>, vector<128x128xbf16>, vector<8x128xf32> -> vector<8x128xf32>
    %c0_15 = arith.constant 0 : index
    %c0_16 = arith.constant 0 : index
    %20 = vector.load %arg7[%c0_15, %c0_16] : memref<1x128xf32, #tpu.memory_space<vmem>>, vector<1x128xf32>
    %21 = vector.broadcast %20 : vector<1x128xf32> to vector<8x128xf32>
    %22 = arith.addf %19, %21 : vector<8x128xf32>
    %cst_17 = arith.constant 0.000000e+00 : f32
    %23 = vector.broadcast %cst_17 : f32 to vector<8x128xf32>
    %24 = arith.maximumf %22, %23 : vector<8x128xf32>
    %25 = arith.truncf %24 : vector<8x128xf32> to vector<8x128xbf16>
    %c0_18 = arith.constant 0 : index
    %c0_19 = arith.constant 0 : index
    %26 = vector.load %arg8[%c0_18, %c0_19] : memref<128x128xbf16, #tpu.memory_space<vmem>>, vector<128x128xbf16>
    %cst_20 = arith.constant dense<0.000000e+00> : vector<8x128xf32>
    %27 = tpu.matmul %25, %26, %cst_20 {dimension_numbers = #tpu.dot_dimension_numbers<[1], [0], [0], [1], [0, 0, 1, 1], [], []>} : vector<8x128xbf16>, vector<128x128xbf16>, vector<8x128xf32> -> vector<8x128xf32>
    %c0_21 = arith.constant 0 : index
    %c0_22 = arith.constant 0 : index
    %28 = vector.load %arg9[%c0_21, %c0_22] : memref<1x128xf32, #tpu.memory_space<vmem>>, vector<1x128xf32>
    %29 = vector.broadcast %28 : vector<1x128xf32> to vector<8x128xf32>
    %30 = arith.addf %27, %29 : vector<8x128xf32>
    %cst_23 = arith.constant 0.000000e+00 : f32
    %31 = vector.broadcast %cst_23 : f32 to vector<8x128xf32>
    %32 = arith.maximumf %30, %31 : vector<8x128xf32>
    %33 = arith.truncf %32 : vector<8x128xf32> to vector<8x128xbf16>
    %c0_24 = arith.constant 0 : index
    %c0_25 = arith.constant 0 : index
    %34 = vector.load %arg10[%c0_24, %c0_25] : memref<128x256xbf16, #tpu.memory_space<vmem>>, vector<128x256xbf16>
    %cst_26 = arith.constant dense<0.000000e+00> : vector<8x256xf32>
    %35 = tpu.matmul %33, %34, %cst_26 {dimension_numbers = #tpu.dot_dimension_numbers<[1], [0], [0], [1], [0, 0, 1, 1], [], []>} : vector<8x128xbf16>, vector<128x256xbf16>, vector<8x256xf32> -> vector<8x256xf32>
    %c0_27 = arith.constant 0 : index
    %c0_28 = arith.constant 0 : index
    %36 = vector.load %arg11[%c0_27, %c0_28] : memref<1x256xf32, #tpu.memory_space<vmem>>, vector<1x256xf32>
    %37 = vector.broadcast %36 : vector<1x256xf32> to vector<8x256xf32>
    %38 = arith.addf %35, %37 : vector<8x256xf32>
    %39 = vector.extract_strided_slice %38 {offsets = [0, 0], sizes = [8, 128], strides = [1, 1]} : vector<8x256xf32> to vector<8x128xf32>
    %40 = vector.extract_strided_slice %38 {offsets = [0, 128], sizes = [8, 128], strides = [1, 1]} : vector<8x256xf32> to vector<8x128xf32>
    %cst_29 = arith.constant 5.000000e-01 : f32
    %41 = vector.broadcast %cst_29 : f32 to vector<8x128xf32>
    %42 = arith.mulf %41, %40 : vector<8x128xf32>
    %43 = math.exp %42 : vector<8x128xf32>
    %c0_30 = arith.constant 0 : index
    %c0_31 = arith.constant 0 : index
    %44 = vector.load %arg12[%c0_30, %c0_31] : memref<8x128xf32, #tpu.memory_space<vmem>>, vector<8x128xf32>
    %45 = arith.mulf %44, %43 : vector<8x128xf32>
    %46 = arith.addf %45, %39 : vector<8x128xf32>
    %c0_32 = arith.constant 0 : index
    %c0_33 = arith.constant 0 : index
    %47 = vector.load %arg13[%c0_32, %c0_33] : memref<8x128xf32, #tpu.memory_space<vmem>>, vector<8x128xf32>
    tpu.vector_store %arg13[%c0_32, %c0_33], %46 {strides = array<i32>} : memref<8x128xf32, #tpu.memory_space<vmem>>, vector<8x128xf32>,
    %c0_34 = arith.constant 0 : index
    %c0_35 = arith.constant 0 : index
    %48 = vector.load %arg14[%c0_34, %c0_35] : memref<8x128xf32, #tpu.memory_space<vmem>>, vector<8x128xf32>
    tpu.vector_store %arg14[%c0_34, %c0_35], %39 {strides = array<i32>} : memref<8x128xf32, #tpu.memory_space<vmem>>, vector<8x128xf32>,
    %c0_36 = arith.constant 0 : index
    %c0_37 = arith.constant 0 : index
    %49 = vector.load %arg15[%c0_36, %c0_37] : memref<8x128xf32, #tpu.memory_space<vmem>>, vector<8x128xf32>
    tpu.vector_store %arg15[%c0_36, %c0_37], %40 {strides = array<i32>} : memref<8x128xf32, #tpu.memory_space<vmem>>, vector<8x128xf32>,
    return
  }
  func.func @transform_0(%arg0: i32) -> (i32, i32) {
    %c0_i32 = arith.constant 0 : i32
    %c0_i32_0 = arith.constant 0 : i32
    return %arg0, %c0_i32 : i32, i32
  }
  func.func @transform_1(%arg0: i32) -> (i32, i32) {
    %c0_i32 = arith.constant 0 : i32
    %c0_i32_0 = arith.constant 0 : i32
    %c0_i32_1 = arith.constant 0 : i32
    return %c0_i32, %c0_i32_0 : i32, i32
  }
  func.func @transform_2(%arg0: i32) -> (i32, i32) {
    %c0_i32 = arith.constant 0 : i32
    %c0_i32_0 = arith.constant 0 : i32
    %c0_i32_1 = arith.constant 0 : i32
    return %c0_i32, %c0_i32_0 : i32, i32
  }
  func.func @transform_3(%arg0: i32) -> (i32, i32) {
    %c0_i32 = arith.constant 0 : i32
    %c0_i32_0 = arith.constant 0 : i32
    %c0_i32_1 = arith.constant 0 : i32
    return %c0_i32, %c0_i32_0 : i32, i32
  }
  func.func @transform_4(%arg0: i32) -> (i32, i32) {
    %c0_i32 = arith.constant 0 : i32
    %c0_i32_0 = arith.constant 0 : i32
    %c0_i32_1 = arith.constant 0 : i32
    return %c0_i32, %c0_i32_0 : i32, i32
  }
  func.func @transform_5(%arg0: i32) -> (i32, i32) {
    %c0_i32 = arith.constant 0 : i32
    %c0_i32_0 = arith.constant 0 : i32
    %c0_i32_1 = arith.constant 0 : i32
    return %c0_i32, %c0_i32_0 : i32, i32
  }
  func.func @transform_6(%arg0: i32) -> (i32, i32) {
    %c0_i32 = arith.constant 0 : i32
    %c0_i32_0 = arith.constant 0 : i32
    %c0_i32_1 = arith.constant 0 : i32
    return %c0_i32, %c0_i32_0 : i32, i32
  }
  func.func @transform_7(%arg0: i32) -> (i32, i32) {
    %c0_i32 = arith.constant 0 : i32
    %c0_i32_0 = arith.constant 0 : i32
    %c0_i32_1 = arith.constant 0 : i32
    return %c0_i32, %c0_i32_0 : i32, i32
  }
  func.func @transform_8(%arg0: i32) -> (i32, i32) {
    %c0_i32 = arith.constant 0 : i32
    %c0_i32_0 = arith.constant 0 : i32
    %c0_i32_1 = arith.constant 0 : i32
    return %c0_i32, %c0_i32_0 : i32, i32
  }
  func.func @transform_9(%arg0: i32) -> (i32, i32) {
    %c0_i32 = arith.constant 0 : i32
    %c0_i32_0 = arith.constant 0 : i32
    %c0_i32_1 = arith.constant 0 : i32
    return %c0_i32, %c0_i32_0 : i32, i32
  }
  func.func @transform_10(%arg0: i32) -> (i32, i32) {
    %c0_i32 = arith.constant 0 : i32
    %c0_i32_0 = arith.constant 0 : i32
    %c0_i32_1 = arith.constant 0 : i32
    return %c0_i32, %c0_i32_0 : i32, i32
  }
  func.func @transform_11(%arg0: i32) -> (i32, i32) {
    %c0_i32 = arith.constant 0 : i32
    %c0_i32_0 = arith.constant 0 : i32
    return %arg0, %c0_i32 : i32, i32
  }
  func.func @transform_12(%arg0: i32) -> (i32, i32) {
    %c0_i32 = arith.constant 0 : i32
    %c0_i32_0 = arith.constant 0 : i32
    return %arg0, %c0_i32 : i32, i32
  }
  func.func @transform_13(%arg0: i32) -> (i32, i32) {
    %c0_i32 = arith.constant 0 : i32
    %c0_i32_0 = arith.constant 0 : i32
    return %arg0, %c0_i32 : i32, i32
  }
  func.func @transform_14(%arg0: i32) -> (i32, i32) {
    %c0_i32 = arith.constant 0 : i32
    %c0_i32_0 = arith.constant 0 : i32
    return %arg0, %c0_i32 : i32, i32
  }
}

</mosaic_0001>

<bundles_post_ra>
// kernel: tpu_custom_call.1
= control target key start
LH: loop header
LB: loop body
LE: loop exit
PB: predicated region body
PF: predicated region fallthrough
CT: control target
= control target key end

     0   :  { %s2667_s0 = inlined_call_operand.hbm [shape: f32[16,128], index: 0, kind: input, shape index: {}]   ;;  %s2668_s1 = inlined_call_operand.hbm [shape: bf16[128,128], index: 1, kind: input, shape index: {}]   ;;  %s2669_s2 = inlined_call_operand.vmem [shape: f32[1,128], index: 2, kind: input, shape index: {}]   ;;  %s2670_s3 = inlined_call_operand.hbm [shape: bf16[128,128], index: 3, kind: input, shape index: {}]   ;;  %s2671_s4 = inlined_call_operand.vmem [shape: f32[1,128], index: 4, kind: input, shape index: {}]   ;;  %s2672_s5 = inlined_call_operand.hbm [shape: bf16[128,128], index: 5, kind: input, shape index: {}]   ;;  %s2673_s6 = inlined_call_operand.vmem [shape: f32[1,128], index: 6, kind: input, shape index: {}]   ;;  %s2674_s7 = inlined_call_operand.hbm [shape: bf16[128,128], index: 7, kind: input, shape index: {}]   ;;  %s2675_s8 = inlined_call_operand.vmem [shape: f32[1,128], index: 8, kind: input, shape index: {}]   ;;  %s2676_s9 = inlined_call_operand.hbm [shape: bf16[128,256], index: 9, kind: input, shape index: {}]   ;;  %s2677_s10 = inlined_call_operand.vmem [shape: f32[1,256], index: 10, kind: input, shape index: {}]   ;;  %s2678_s11 = inlined_call_operand.vmem [shape: f32[16,128], index: 11, kind: input, shape index: {}]   ;;  %s2679_s12 = inlined_call_operand.hbm [shape: f32[16,128], index: 12, kind: output, shape index: {0}]   ;;  %s2680_s13 = inlined_call_operand.hbm [shape: f32[16,128], index: 13, kind: output, shape index: {1}]   ;;  %s2681_s14 = inlined_call_operand.hbm [shape: f32[16,128], index: 14, kind: output, shape index: {2}]  }
   0x1   :  { %2689 = sst [smem:[#allocation23_spill]] %s2667_s0 }
   0x2   :  { %2690 = sst [smem:[#allocation24_spill]] %s2668_s1 }
   0x3   :  { %2691 = sst [smem:[#allocation25_spill]] %s2669_s2 }
   0x4   :  { %2692 = sst [smem:[#allocation26_spill]] %s2670_s3 }
   0x5   :  { %2693 = sst [smem:[#allocation27_spill]] %s2671_s4 }
   0x6   :  { %2694 = sst [smem:[#allocation28_spill]] %s2675_s8 }
   0x7   :  { %2695 = sst [smem:[#allocation29_spill]] %s2677_s10 }
   0x8   :  { %2696 = sst [smem:[#allocation30_spill]] %s2678_s11 }
   0x9   :  { %2697 = sst [smem:[#allocation31_spill]] %s2679_s12 }
   0xa   :  { %2698 = sst [smem:[#allocation32_spill]] %s2680_s13 }
   0xb   :  { %2699 = sst [smem:[#allocation33_spill]] %s2681_s14 }
   0xc   :  { %20 = vsyncpa [#allocation3], 0 }
   0xd   :  { %22 = vsyncpa [#allocation3 + $0x1], 0 }
   0xe   :  { %23 = vsyncpa [#allocation6], 0 }
   0xf   :  { %24 = vsyncpa [#allocation9], 0 }
  0x10   :  { %25 = vsyncpa [#allocation12], 0 }
  0x11   :  { %26 = vsyncpa [#allocation4], 0 }
  0x12   :  { %28 = vsyncpa [#allocation4 + $0x1], 0 }
  0x13   :  { %29 = vsyncpa [#allocation15], 0 }
  0x14   :  { %31 = vsyncpa [#allocation15 + $0x1], 0  ;;  %s2215_s29 = smov 0   ;;  %s2217_s30 = smov 0  }
  0x15   :  { %s2219_s15 = smov 0   ;;  %s2221_s16 = smov 0  }
  0x16 LB: > { %s2124_s17 = smov [#allocation5]   ;;  %s2236_s19 = sadd.s32 4294967295, %s2122_s16   ;;  %s2122_s16 = sphi %s2221_s16, %s2733_s16   ;;  %s2118_s15 = sphi %s2219_s15, %s2732_s15   ;;  %s2114_s30 = sphi %s2217_s30, %s2731_s30   ;;  %s2110_s29 = sphi %s2215_s29, %s2730_s29  }
  0x17   : > { %s394_s18 = sshll.u32 %s2124_s17, 4  ;;  %p1446_p0 = scmp.ge.s32.totalorder %s2122_s16, 1  ;;  %s2241_s18 = int_to_ptr.vmem [resolvable:$true] %s394_s18 }
  0x18   : > { %p2685_p1 = scmp.eq.s32.totalorder %s2236_s19, 0  ;;  %p382_p2 = scmp.lt.s32.totalorder %s2122_s16, 3 }
  0x19   : > { %s2125_s21 = smov [#allocation8]   ;;  %s2126_s24 = smov [#allocation7]  }
  0x1a   : > { %p2243_p3 = pnand %p1446_p0, %p382_p2  ;;  %s426_s22 = sshll.u32 %s2125_s21, 4  ;;  %s2256_s22 = int_to_ptr.vmem [resolvable:$true] %s426_s22 }
  0x1b   : > { %s410_s25 = sshll.u32 %s2126_s24, 4  ;;  %s2702_s1 = sld [smem:[#allocation24_spill]]  ;;  %s2258_s25 = int_to_ptr.vmem [resolvable:$true] %s410_s25 }
  0x1c   : > { %s2700_s20 = scalar_select %p2243_p3, 1, 0 }
  0x1d   : > { %p1670_p5 = pneg %p2243_p3 }
  0x1f   : > { %p2252_p6 = pnand %p1670_p5, %p2685_p1 }
  0x21   : > { %s1814_s28 = scalar_lea.hbm %s2702_s1, 1024  ;;  %p2268_p8 = pneg %p2252_p6 }
  0x22   : > { %p1815_p7 = scmp.ne.s32.totalorder %s2702_s1, %s1814_s28  ;;  %p1821_p11 = scmp.lt.u32.totalorder %s1814_s28, %s2702_s1 }
  0x24   : > { %p1817_p9 = pnand %p2268_p8, %p1815_p7 }
  0x26   : > { %p1818_p10 = pneg %p1817_p9 }
  0x28   : > { %p1823_p12 = pnand %p1821_p11, %p1818_p10 }
  0x2a   : > { %1826 = shalt.err (!%p1823_p12)
}
  0x2b   : > { %s1827_s12 = scalar_lea.vmem %s2241_s18, 1024  ;;  %p1835_p5 = scmp.lt.s32.totalorder %s2241_s18, %s2241_s18 }
  0x2c   : > { %p1828_p13 = scmp.ne.s32.totalorder %s2241_s18, %s1827_s12  ;;  %p1836_p4 = scmp.lt.s32.totalorder %s1827_s12, %s1827_s12 }
  0x2e   : > { %p1830_p0 = pnand %p1828_p13, %p2268_p8  ;;  %p1837_p7 = por %p1836_p4, %p1835_p5 }
  0x30   : > { %p1831_p2 = pneg %p1830_p0 }
  0x32   : > { %p1838_p9 = pnand %p1837_p7, %p1831_p2 }
  0x34   : > { %1841 = shalt.err (!%p1838_p9)
}
  0x35   : > { %s2127_s26 = smov 64   ;;  %s2128_s11 = smov 4  }
  0x36   : > { %1673 = dma.hbm_to_vmem [thread:$0]  (!%p2252_p6), %s2702_s1, 1024, %s2241_s18, [#allocation6], %s2127_s26, %s2127_s26, %s2128_s11  }
  0x37   : > { %s1842_s12 = scalar_lea.hbm %s2672_s5, 1024 }
  0x38   : > { %p1843_p4 = scmp.ne.s32.totalorder %s2672_s5, %s1842_s12  ;;  %p1849_p12 = scmp.lt.u32.totalorder %s1842_s12, %s2672_s5 }
  0x3a   : > { %p1845_p10 = pnand %p1843_p4, %p2268_p8 }
  0x3c   : > { %p1846_p11 = pneg %p1845_p10 }
  0x3e   : > { %p1851_p13 = pnand %p1849_p12, %p1846_p11 }
  0x40   : > { %1854 = shalt.err (!%p1851_p13)
}
  0x41   : > { %s1855_s18 = scalar_lea.vmem %s2256_s22, 1024  ;;  %p1863_p7 = scmp.lt.s32.totalorder %s2256_s22, %s2256_s22 }
  0x42   : > { %p1856_p0 = scmp.ne.s32.totalorder %s2256_s22, %s1855_s18  ;;  %p1864_p9 = scmp.lt.s32.totalorder %s1855_s18, %s1855_s18 }
  0x44   : > { %p1858_p2 = pnand %p1856_p0, %p2268_p8  ;;  %p1865_p4 = por %p1864_p9, %p1863_p7 }
  0x46   : > { %p1859_p5 = pneg %p1858_p2 }
  0x48   : > { %p1866_p10 = pnand %p1865_p4, %p1859_p5 }
  0x4a   : > { %1869 = shalt.err (!%p1866_p10)
}
  0x4b   : > { %1679 = dma.hbm_to_vmem [thread:$0]  (!%p2252_p6), %s2672_s5, 1024, %s2256_s22, [#allocation9], %s2127_s26, %s2127_s26, %s2128_s11  }
  0x4c   : > { %s2704_s3 = sld [smem:[#allocation26_spill]] }
  0x52   : > { %s1870_s27 = scalar_lea.hbm %s2704_s3, 1024 }
  0x53   : > { %p1871_p11 = scmp.ne.s32.totalorder %s2704_s3, %s1870_s27  ;;  %p1877_p0 = scmp.lt.u32.totalorder %s1870_s27, %s2704_s3 }
  0x55   : > { %p1873_p12 = pnand %p1871_p11, %p2268_p8 }
  0x57   : > { %p1874_p13 = pneg %p1873_p12 }
  0x59   : > { %p1879_p2 = pnand %p1877_p0, %p1874_p13 }
  0x5b   : > { %1882 = shalt.err (!%p1879_p2)
}
  0x5c   : > { %s1883_s22 = scalar_lea.vmem %s2258_s25, 1024  ;;  %p1891_p4 = scmp.lt.s32.totalorder %s2258_s25, %s2258_s25 }
  0x5d   : > { %p1884_p5 = scmp.ne.s32.totalorder %s2258_s25, %s1883_s22  ;;  %p1892_p10 = scmp.lt.s32.totalorder %s1883_s22, %s1883_s22 }
  0x5f   : > { %p1886_p7 = pnand %p1884_p5, %p2268_p8  ;;  %p1893_p11 = por %p1892_p10, %p1891_p4 }
  0x61   : > { %p1887_p9 = pneg %p1886_p7 }
  0x63   : > { %p1894_p12 = pnand %p1893_p11, %p1887_p9 }
  0x65   : > { %1897 = shalt.err (!%p1894_p12)
}
  0x66   : > { %1676 = dma.hbm_to_vmem [thread:$0]  (!%p2252_p6), %s2704_s3, 1024, %s2258_s25, [#allocation6], %s2127_s26, %s2127_s26, %s2128_s11  }
  0x67   : > { %s2129_s10 = smov [#allocation10]   ;;  %s2130_s14 = smov [#allocation11]  }
  0x68   : > { %s442_s13 = sshll.u32 %s2129_s10, 4  ;;  %s458_s27 = sshll.u32 %s2130_s14, 4  ;;  %s443_s13 = int_to_ptr.vmem [resolvable:$true] %s442_s13  ;;  %s459_s27 = int_to_ptr.vmem [resolvable:$true] %s458_s27 }
  0x69   : > { %s1898_s24 = scalar_lea.hbm %s2674_s7, 1024 }
  0x6a   : > { %p1899_p13 = scmp.ne.s32.totalorder %s2674_s7, %s1898_s24  ;;  %p1905_p5 = scmp.lt.u32.totalorder %s1898_s24, %s2674_s7 }
  0x6c   : > { %p1901_p0 = pnand %p1899_p13, %p2268_p8 }
  0x6e   : > { %p1902_p2 = pneg %p1901_p0 }
  0x70   : > { %p1907_p7 = pnand %p1905_p5, %p1902_p2 }
  0x72   : > { %1910 = shalt.err (!%p1907_p7)
}
  0x73   : > { %s1911_s25 = scalar_lea.vmem %s443_s13, 1024  ;;  %p1919_p11 = scmp.lt.s32.totalorder %s443_s13, %s443_s13 }
  0x74   : > { %p1912_p9 = scmp.ne.s32.totalorder %s443_s13, %s1911_s25  ;;  %p1920_p12 = scmp.lt.s32.totalorder %s1911_s25, %s1911_s25 }
  0x76   : > { %p1914_p4 = pnand %p1912_p9, %p2268_p8  ;;  %p1921_p1 = por %p1920_p12, %p1919_p11 }
  0x78   : > { %p1915_p10 = pneg %p1914_p4 }
  0x7a   : > { %p1922_p3 = pnand %p1921_p1, %p1915_p10 }
  0x7c   : > { %1925 = shalt.err (!%p1922_p3)
}
  0x7d   : > { %1682 = dma.hbm_to_vmem [thread:$0]  (!%p2252_p6), %s2674_s7, 1024, %s443_s13, [#allocation9], %s2127_s26, %s2127_s26, %s2128_s11  }
  0x7e   : > { %s1926_s28 = scalar_lea.hbm %s2676_s9, 2048 }
  0x7f   : > { %p1927_p1 = scmp.ne.s32.totalorder %s2676_s9, %s1926_s28  ;;  %p1933_p0 = scmp.lt.u32.totalorder %s1926_s28, %s2676_s9 }
  0x81   : > { %p1929_p3 = pnand %p1927_p1, %p2268_p8 }
  0x83   : > { %p1930_p13 = pneg %p1929_p3 }
  0x85   : > { %p1935_p2 = pnand %p1933_p0, %p1930_p13 }
  0x87   : > { %1938 = shalt.err (!%p1935_p2)
}
  0x88   : > { %s1939_s18 = scalar_lea.vmem %s459_s27, 2048  ;;  %p1947_p4 = scmp.lt.s32.totalorder %s459_s27, %s459_s27 }
  0x89   : > { %p1940_p5 = scmp.ne.s32.totalorder %s459_s27, %s1939_s18  ;;  %p1948_p10 = scmp.lt.s32.totalorder %s1939_s18, %s1939_s18 }
  0x8b   : > { %p1942_p7 = pnand %p1940_p5, %p2268_p8  ;;  %p1949_p11 = por %p1948_p10, %p1947_p4 }
  0x8d   : > { %p1943_p9 = pneg %p1942_p7 }
  0x8f   : > { %p1950_p12 = pnand %p1949_p11, %p1943_p9 }
  0x91   : > { %1953 = shalt.err (!%p1950_p12)
}
  0x92   : > { %s2131_s26 = smov 128   ;;  %s2132_s21 = smov 8  }
  0x93   : > { %1685 = dma.hbm_to_vmem [thread:$0]  (!%p2252_p6), %s2676_s9, 2048, %s459_s27, [#allocation12], %s2131_s26, %s2131_s26, %s2132_s21  }
  0x94   : > { %s2688_s25 = sadd.s32 4294967294, %s2122_s16   ;;  %s2385_s1 = sadd.s32 1, %s2122_s16  }
  0x95   : > { %s44_s8 = sadd.s32 1, %s2118_s15  ;;  %s41_s10 = ssub.s32 %s2122_s16, %s2385_s1 }
  0x96   : > { %p51_p8 = scmp.ne.s32.totalorder %s2118_s15, %s2114_s30  ;;  %p42_p1 = scmp.eq.s32.totalorder %s41_s10, 0 }
  0x97   : > { %p52_p3 = scmp.eq.s32.totalorder %s2122_s16, 0  ;;  %p57_p13 = scmp.ne.s32.totalorder %s2114_s30, %s2110_s29 }
  0x98   : > { %p317_p0 = scmp.eq.s32.totalorder %s2236_s19, 1  ;;  %p2705_p5 = scmp.eq.s32.totalorder %s2236_s19, 0 }
  0x99   : > { %s2397_s14 = scalar_select %p42_p1, %s2118_s15, %s44_s8  }
  0x9a   : > { %p53_p2 = por %p52_p3, %p51_p8  ;;  %p2401_p7 = por %p2705_p5, %p57_p13 }
  0x9b   : > { %p2405_p6 = por %p317_p0, %p51_p8  ;;  %p323_p9 = scmp.eq.s32.totalorder %s2688_s25, 1 }
  0x9c   : > { %p1705_p4 = scmp.lt.s32.totalorder %s2122_s16, 2  ;;  %s475_s28 = sand.u32 1, %s2118_s15  }
  0x9d   : > { %s2707_s27 = scalar_select %p2405_p6, 1, 0 }
  0x9e   : > { %p2413_p10 = por %p323_p9, %p57_p13  ;;  %s1453_s24 = sshll.u32 %s475_s28, 3 }
  0x9f   : > { %s1454_s12 = sshll.u32 %s2122_s16, 7  ;;  %s2709_s0 = sld [smem:[#allocation23_spill]] }
  0xa0   : > { %s2708_s17 = scalar_select %p2413_p10, 1, 0 }
  0xa1   : > { %s479_s21 = scalar_lea.vmem [#allocation2], %s1453_s24  ;;  %p2423_p11 = pnand %p1705_p4, %p53_p2 }
  0xa2   : > { %s486_s11 = sshll.u32 %s479_s21, 4  ;;  %s476_s8 = scalar_lea.sflag [#allocation3], %s475_s28  ;;  %s2427_s11 = int_to_ptr.vmem [resolvable:$true] %s486_s11 }
  0xa3   : > { %p1956_p8 = pneg %p2423_p11 }
  0xa5   : > { %s2421_s26 = scalar_lea.hbm %s2709_s0, %s1454_s12  ;;  %s1959_s22 = scalar_lea.hbm %s2709_s0, 256 }
  0xa6   : > { %s1954_s10 = scalar_lea.hbm %s2421_s26, 128  ;;  %p1960_p13 = scmp.lt.u32.totalorder %s2421_s26, %s2709_s0 }
  0xa7   : > { %p1955_p12 = scmp.ne.s32.totalorder %s2421_s26, %s1954_s10  ;;  %p1961_p0 = scmp.lt.u32.totalorder %s1959_s22, %s1954_s10 }
  0xa8   : > { %p1963_p5 = scmp.lt.u32.totalorder %s1954_s10, %s2421_s26 }
  0xa9   : > { %p1957_p1 = pnand %p1956_p8, %p1955_p12  ;;  %p1962_p2 = por %p1961_p0, %p1960_p13 }
  0xab   : > { %p1958_p3 = pneg %p1957_p1  ;;  %p1964_p9 = por %p1963_p5, %p1962_p2 }
  0xad   : > { %p1965_p4 = pnand %p1964_p9, %p1958_p3 }
  0xaf   : > { %1968 = shalt.err (!%p1965_p4)
}
  0xb0   : > { %s1969_s28 = scalar_lea.vmem %s2427_s11, 128  ;;  %s2133_s12 = smov [#allocation2]  }
  0xb1   : > { %p1970_p12 = scmp.ne.s32.totalorder %s2427_s11, %s1969_s28  ;;  %s1974_s24 = sshll.u32 %s2133_s12, 4  ;;  %s1975_s24 = int_to_ptr.vmem [resolvable:$false] %s1974_s24 }
  0xb2   : > { %s1976_s18 = scalar_lea.vmem %s1975_s24, 256  ;;  %p1977_p6 = scmp.lt.s32.totalorder %s2427_s11, %s1975_s24 }
  0xb3   : > { %p1972_p1 = pnand %p1970_p12, %p1956_p8  ;;  %p1978_p13 = scmp.lt.s32.totalorder %s1976_s18, %s1969_s28 }
  0xb5   : > { %p1973_p10 = pneg %p1972_p1  ;;  %p1979_p0 = por %p1978_p13, %p1977_p6 }
  0xb7   : > { %p1980_p2 = pnand %p1979_p0, %p1973_p10 }
  0xb9   : > { %1983 = shalt.err (!%p1980_p2)
}
  0xba   : > { %1689 = dma.hbm_to_vmem [thread:$0]  (!%p2423_p11), %s2421_s26, 128, %s2427_s11, %s476_s8  }
  0xbb   : > { %p2711_p3 = scmp.ne.s32.totalorder %s2700_s20, 0 }
  0xbc   : > { %s2457_s10 = sand.u32 (!%p2711_p3), 1, %s2114_s30  }
  0xbd   : > { %502 = sbr.rel (%p2711_p3) target bundleno = 1393 (0x571), region = 68  ;;  %s2460_s22 = sshll.u32 (!%p2711_p3), %s2457_s10, 3 }
  0xbe   : > { %s505_s21 = scalar_lea.sflag (!%p2711_p3), [#allocation3], %s2457_s10  ;;  %s508_s28 = scalar_lea.vmem (!%p2711_p3), [#allocation2], %s2460_s22 }
  0xc4   : > { %2085 = dma.done.wait (%p2401_p7), %s505_s21, 128  }
  0xc5   : > { %2087 = vsyncadd (%p2401_p7), %s505_s21, 4294967168  ;;  %p2712_p6 = scmp.eq.s32.totalorder %s2236_s19, 0 }
  0xc7   : > { %2089 = dma.done.wait (%p2712_p6), [#allocation6], 2048   ;;  %p2713_p10 = pmov %p2712_p6 }
  0xc8   : > { %p2714_p11 = pmov %p2712_p6 }
  0xc9   : > { %2091 = vsyncadd (%p2713_p10), [#allocation6], 4294965248 }
  0xca   : > { %2093 = dma.done.wait (%p2714_p11), [#allocation9], 2048   ;;  %p2715_p8 = pmov %p2712_p6 }
  0xcb   : > { %p2716_p5 = pmov %p2712_p6 }
  0xcc   : > { %2095 = vsyncadd (%p2715_p8), [#allocation9], 4294965248 }
  0xcd   : > { %2097 = dma.done.wait (%p2716_p5), [#allocation12], 2048   ;;  %p2717_p9 = pmov %p2716_p5 }
  0xce   : > { %v2134_v0 = vmov 0.0   ;;  %vm2135_vm0 = vmmov 0   ;;  %v1756_v1 = vld [vmem:[#allocation5] sm:$0xff]   ;;  %v1757_v2 = vld [vmem:[#allocation5 + $0x8] sm:$0xff]   ;;  %v1758_v3 = vld [vmem:[#allocation5 + $0x10] sm:$0xff]   ;;  %s2718_s2 = sld [smem:[#allocation25_spill]] }
  0xcf   : > { %2099 = vsyncadd (%p2717_p9), [#allocation12], 4294965248  ;;  %1562 = vmatprep.subr.bf16.mxu0 %v2134_v0  ;;  %1578 = vmatprep.mubr.msk.bf16.mxu0 %vm2135_vm0, %v2134_v0  ;;  %v1764_v4 = vld [vmem:[#allocation7] sm:$0xff]   ;;  %v1759_v5 = vld [vmem:[#allocation5 + $0x18] sm:$0xff]   ;;  %s2719_s4 = sld [smem:[#allocation27_spill]]  ;;  %s2720_s18 = sld [smem:[#allocation28_spill]] }
  0xd0   : > { %1582 = vmatprep.subr.bf16.mxu1 %v2134_v0  ;;  %1598 = vmatprep.mubr.msk.bf16.mxu1 %vm2135_vm0, %v2134_v0  ;;  %v1765_v6 = vld [vmem:[#allocation7 + $0x8] sm:$0xff]   ;;  %v1760_v7 = vld [vmem:[#allocation5 + $0x20] sm:$0xff]   ;;  %v1766_v8 = vld [vmem:[#allocation7 + $0x10] sm:$0xff]   ;;  %s2721_s20 = sld [smem:[#allocation29_spill]]  ;;  %s1209_s23 = sand.u32 1, %s2236_s19  }
  0xd1   : > { %1563 = vmatpush3.bf16.msra.mxu0 %v1756_v1  ;;  %1583 = vmatpush3.bf16.msra.mxu1 %v1764_v4  ;;  %v1761_v9 = vld [vmem:[#allocation5 + $0x28] sm:$0xff]   ;;  %v1767_v10 = vld [vmem:[#allocation7 + $0x18] sm:$0xff]   ;;  %v1762_v11 = vld [vmem:[#allocation5 + $0x30] sm:$0xff]   ;;  %s2539_s26 = sshll.u32 %s2236_s19, 7  ;;  %s579_s11 = scalar_lea.vmem [#allocation14], %s2460_s22 }
  0xd2   : > { %1564 = vmatprep.subr.bf16.mxu0 %v2134_v0  ;;  %1584 = vmatprep.subr.bf16.mxu1 %v2134_v0  ;;  %v1768_v12 = vld [vmem:[#allocation7 + $0x20] sm:$0xff]   ;;  %v1763_v13 = vld [vmem:[#allocation5 + $0x38] sm:$0xff]   ;;  %v1769_v15 = vld [vmem:[#allocation7 + $0x28] sm:$0xff]   ;;  %s1241_s13 = sshll.u32 %s579_s11, 4  ;;  %s586_s8 = scalar_lea.vmem [#allocation16], %s2460_s22  ;;  %s2551_s13 = int_to_ptr.vmem [resolvable:$true] %s1241_s13 }
  0xd3   : > { %v592_v14 = vld [vmem:[%s508_s28] sm:$0xff]  ;;  %v1772_v19 = vld [vmem:[#allocation8] sm:$0xff]   ;;  %v1773_v20 = vld [vmem:[#allocation8 + $0x8] sm:$0xff]   ;;  %s1254_s12 = sshll.u32 %s586_s8, 4  ;;  %s2722_s25 = sld [smem:[#allocation32_spill]]  ;;  %s2560_s12 = int_to_ptr.vmem [resolvable:$true] %s1254_s12 }
  0xd4   : > { %v593_v16 = vpack.c.bf16 %v592_v14, %v592_v14  ;;  %v1770_v17 = vld [vmem:[#allocation7 + $0x30] sm:$0xff]   ;;  %v1771_v18 = vld [vmem:[#allocation7 + $0x38] sm:$0xff]   ;;  %v1776_v23 = vld [vmem:[#allocation8 + $0x20] sm:$0xff]   ;;  %p587_p7 = scmp.lt.s32.totalorder %s2236_s19, 1  ;;  %s2563_s24 = scalar_lea.sflag [#allocation15], %s1209_s23 }
  0xd5   : > { %1565 = vmatpush3.bf16.msra.mxu0 %v1757_v2  ;;  %1585 = vmatpush3.bf16.msra.mxu1 %v1765_v6  ;;  %v1774_v21 = vld [vmem:[#allocation8 + $0x10] sm:$0xff]   ;;  %v1775_v22 = vld [vmem:[#allocation8 + $0x18] sm:$0xff]   ;;  %v1777_v24 = vld [vmem:[#allocation8 + $0x28] sm:$0xff]   ;;  %p2724_p12 = scmp.ne.s32.totalorder %s2707_s27, 0  ;;  %s2137_s3 = smov [#allocation14]  }
  0xd6   : > { %1566 = vmatprep.subr.bf16.mxu0 %v2134_v0  ;;  %1586 = vmatprep.subr.bf16.mxu1 %v2134_v0  ;;  %v1466_v25 = vld [vmem:[%s2718_s2] ss:$0 sm:$0xff]  ;;  %v1779_v34 = vld [vmem:[#allocation8 + $0x38] sm:$0xff]   ;;  %v1780_v35 = vld [vmem:[#allocation10] sm:$0xff]  }
  0xd7   : > { %v1778_v33 = vld [vmem:[#allocation8 + $0x30] sm:$0xff]   ;;  %v1781_v36 = vld [vmem:[#allocation10 + $0x8] sm:$0xff]   ;;  %v1783_v38 = vld [vmem:[#allocation10 + $0x18] sm:$0xff]  }
  0xd8   : > { %v1782_v37 = vld [vmem:[#allocation10 + $0x10] sm:$0xff]   ;;  %v1784_v39 = vld [vmem:[#allocation10 + $0x20] sm:$0xff]   ;;  %v1785_v40 = vld [vmem:[#allocation10 + $0x28] sm:$0xff]  }
  0xd9   : > { %1567 = vmatpush3.bf16.msra.mxu0 %v1758_v3  ;;  %1587 = vmatpush3.bf16.msra.mxu1 %v1766_v8  ;;  %v1475_v41 = vld [vmem:[%s2719_s4] ss:$0 sm:$0xff]  ;;  %v1787_v50 = vld [vmem:[#allocation10 + $0x38] sm:$0xff]   ;;  %v1788_v51 = vld [vmem:[#allocation11] ss:$8 sps:$4 sm:$0xff]   ;;  %s2547_s0 = scalar_lea.hbm %s2722_s25, %s2539_s26  ;;  %s1988_s4 = sshll.u32 %s2137_s3, 4  ;;  %s1989_s4 = int_to_ptr.vmem [resolvable:$false] %s1988_s4 }
  0xda   : > { %1568 = vmatprep.subr.bf16.mxu0 %v2134_v0  ;;  %1588 = vmatprep.subr.bf16.mxu1 %v2134_v0  ;;  %v1786_v49 = vld [vmem:[#allocation10 + $0x30] sm:$0xff]   ;;  %v1790_v52 = vld [vmem:[#allocation11 + $0x4] ss:$8 sps:$4 sm:$0xff]   ;;  %v1794_v56 = vld [vmem:[#allocation11 + $0x20] ss:$8 sps:$4 sm:$0xff]   ;;  %s1990_s21 = scalar_lea.vmem %s1989_s4, 256  ;;  %p1991_p0 = scmp.lt.s32.totalorder %s2551_s13, %s1989_s4 }
  0xdb   : > { %v1793_v53 = vld [vmem:[#allocation11 + $0x14] ss:$8 sps:$4 sm:$0xff]   ;;  %v1791_v54 = vld [vmem:[#allocation11 + $0x10] ss:$8 sps:$4 sm:$0xff]   ;;  %v1796_v55 = vld [vmem:[#allocation11 + $0x24] ss:$8 sps:$4 sm:$0xff]  }
  0xdc   : > { %v1799_v57 = vld [vmem:[#allocation11 + $0x34] ss:$8 sps:$4 sm:$0xff]   ;;  %v1797_v58 = vld [vmem:[#allocation11 + $0x30] ss:$8 sps:$4 sm:$0xff]   ;;  %v1802_v59 = vld [vmem:[#allocation11 + $0x44] ss:$8 sps:$4 sm:$0xff]  }
  0xdd   : > { %1569 = vmatpush3.bf16.msra.mxu0 %v1759_v5  ;;  %1589 = vmatpush3.bf16.msra.mxu1 %v1767_v10  ;;  %v1800_v60 = vld [vmem:[#allocation11 + $0x40] ss:$8 sps:$4 sm:$0xff]   ;;  %v1805_v61 = vld [vmem:[#allocation11 + $0x54] ss:$8 sps:$4 sm:$0xff]   ;;  %v1803_v62 = vld [vmem:[#allocation11 + $0x50] ss:$8 sps:$4 sm:$0xff]  }
  0xde   : > { %1570 = vmatprep.subr.bf16.mxu0 %v2134_v0  ;;  %1590 = vmatprep.subr.bf16.mxu1 %v2134_v0  ;;  %v1808_v63 = vld [vmem:[#allocation11 + $0x64] ss:$8 sps:$4 sm:$0xff]   ;;  %v1484_v1 = vld [vmem:[%s2673_s6] ss:$0 sm:$0xff] }
  0xdf   : > { %v1809_v10 = vld [vmem:[#allocation11 + $0x70] ss:$8 sps:$4 sm:$0xff]  }
  0xe1   : > { %1571 = vmatpush3.bf16.msra.mxu0 %v1760_v7  ;;  %1591 = vmatpush3.bf16.msra.mxu1 %v1768_v12  ;;  %v1493_v12 = vld [vmem:[%s2720_s18] ss:$0 sm:$0xff]  ;;  %s1984_s18 = scalar_lea.vmem %s2551_s13, 128 }
  0xe2   : > { %1572 = vmatprep.subr.bf16.mxu0 %v2134_v0  ;;  %1592 = vmatprep.subr.bf16.mxu1 %v2134_v0  ;;  %p1985_p4 = scmp.ne.s32.totalorder %s2551_s13, %s1984_s18  ;;  %p1992_p2 = scmp.lt.s32.totalorder %s1990_s21, %s1984_s18 }
  0xe4   : > { %p1986_p1 = pnand %p1985_p4, %p2724_p12  ;;  %p1993_p3 = por %p1992_p2, %p1991_p0 }
  0xe5   : > { %1573 = vmatpush3.bf16.msra.mxu0 %v1761_v9  ;;  %1593 = vmatpush3.bf16.msra.mxu1 %v1769_v15  ;;  %v1811_v9 = vld [vmem:[#allocation11 + $0x74] ss:$8 sps:$4 sm:$0xff]  }
  0xe6   : > { %1574 = vmatprep.subr.bf16.mxu0 %v2134_v0  ;;  %1594 = vmatprep.subr.bf16.mxu1 %v2134_v0  ;;  %p1987_p13 = pneg %p1986_p1 }
  0xe8   : > { %p1994_p6 = pnand %p1993_p3, %p1987_p13 }
  0xe9   : > { %1575 = vmatpush3.bf16.msra.mxu0 %v1762_v11  ;;  %1595 = vmatpush3.bf16.msra.mxu1 %v1770_v17  ;;  %v2136_v11 = vmov 0  }
  0xea   : > { %1576 = vmatprep.subr.bf16.mxu0 %v2134_v0  ;;  %1596 = vmatprep.subr.bf16.mxu1 %v2134_v0 }
  0xed   : > { %1577 = vmatpush3.bf16.msra.mxu0 %v1763_v13  ;;  %1597 = vmatpush3.bf16.msra.mxu1 %v1771_v18 }
  0xee   : > { %1602 = vmatprep.subr.bf16.mxu0 %v2134_v0  ;;  %1622 = vmatprep.subr.bf16.mxu1 %v2134_v0 }
  0xf0   : > { %1579 = vmatmul.mubr.bf16.vlgmr.msra.gmra.mrb[0].mxu0 %v593_v16 }
  0xf1   : > { %1618 = vmatprep.mubr.msk.bf16.mxu0 %vm2135_vm0, %v2134_v0  ;;  %1603 = vmatpush3.bf16.msra.mxu0 %v1772_v19 }
  0xf2   : > { %1604 = vmatprep.subr.bf16.mxu0 %v2134_v0 }
  0xf5   : > { %1605 = vmatpush3.bf16.msra.mxu0 %v1773_v20  ;;  %v1064_v20 = vlaneseq }
  0xf6   : > { %1606 = vmatprep.subr.bf16.mxu0 %v2134_v0 }
  0xf9   : > { %1607 = vmatpush3.bf16.msra.mxu0 %v1774_v21  ;;  %v1065_v21 = vshrl.u32 %v1064_v20, 7 }
  0xfa   : > { %1608 = vmatprep.subr.bf16.mxu0 %v2134_v0 }
  0xfd   : > { %1609 = vmatpush3.bf16.msra.mxu0 %v1775_v22  ;;  %v1066_v22 = vsub.s32 0, %v1065_v21 }
  0xfe   : > { %1610 = vmatprep.subr.bf16.mxu0 %v2134_v0 }
 0x101   : > { %1611 = vmatpush3.bf16.msra.mxu0 %v1776_v23  ;;  %v1062_v23 = vld [vmem:[%s2721_s20] sm:$0x3]  ;;  %s2723_s20 = sld [smem:[#allocation33_spill]] }
 0x102   : > { %1612 = vmatprep.subr.bf16.mxu0 %v2134_v0 }
 0x105   : > { %1613 = vmatpush3.bf16.msra.mxu0 %v1777_v24  ;;  %v1070_v24 = vsub.s32 1, %v1065_v21 }
 0x106   : > { %1614 = vmatprep.subr.bf16.mxu0 %v2134_v0 }
 0x107   : > { %s2558_s2 = scalar_lea.hbm %s2723_s20, %s2539_s26 }
 0x109   : > { %1615 = vmatpush3.bf16.msra.mxu0 %v1778_v33 }
 0x10a   : > { %1616 = vmatprep.subr.bf16.mxu0 %v2134_v0 }
 0x10d   : > { %1617 = vmatpush3.bf16.msra.mxu0 %v1779_v34 }
 0x10e   : > { %1154 = vmatprep.subr.bf16.mxu0 %v1790_v52 }
 0x1c3   : > { %v699_v26 = vpop.f32.mrb[0].mxu0 }
 0x1c4   : > { %v700_v27 = vadd.f32 %v1466_v25, %v699_v26  ;;  %v1580_v28 = vpop.f32.mrb[1].mxu0  ;;  %v1067_v25 = vrot.slane %v1062_v23, %v1066_v22  ;;  %v1071_v26 = vrot.slane %v1062_v23, %v1070_v24 }
 0x1c5   : > { %v702_v29 = vpop.f32.mrb[2].mxu0 }
 0x1c6   : > { %v705_v30 = vmax.f32 %v700_v27, 0.0  ;;  %v1581_v31 = vpop.f32.mrb[3].mxu0 }
 0x1c8   : > { %v706_v32 = vpack.c.bf16 %v705_v30, %v705_v30 }
 0x1ca   : > { %1599 = vmatmul.mubr.bf16.vlgmr.msra.gmra.mrb[0].mxu1 %v706_v32 }
 0x1cb   : > { %1638 = vmatprep.mubr.msk.bf16.mxu1 %vm2135_vm0, %v2134_v0  ;;  %1623 = vmatpush3.bf16.msra.mxu1 %v1780_v35 }
 0x1cc   : > { %1624 = vmatprep.subr.bf16.mxu1 %v2134_v0 }
 0x1cf   : > { %1625 = vmatpush3.bf16.msra.mxu1 %v1781_v36 }
 0x1d0   : > { %1626 = vmatprep.subr.bf16.mxu1 %v2134_v0 }
 0x1d3   : > { %1627 = vmatpush3.bf16.msra.mxu1 %v1782_v37 }
 0x1d4   : > { %1628 = vmatprep.subr.bf16.mxu1 %v2134_v0 }
 0x1d7   : > { %1629 = vmatpush3.bf16.msra.mxu1 %v1783_v38 }
 0x1d8   : > { %1630 = vmatprep.subr.bf16.mxu1 %v2134_v0 }
 0x1db   : > { %1631 = vmatpush3.bf16.msra.mxu1 %v1784_v39 }
 0x1dc   : > { %1632 = vmatprep.subr.bf16.mxu1 %v2134_v0 }
 0x1df   : > { %1633 = vmatpush3.bf16.msra.mxu1 %v1785_v40 }
 0x1e0   : > { %1634 = vmatprep.subr.bf16.mxu1 %v2134_v0 }
 0x1e3   : > { %1635 = vmatpush3.bf16.msra.mxu1 %v1786_v49 }
 0x1e4   : > { %1636 = vmatprep.subr.bf16.mxu1 %v2134_v0  ;;  %v1806_v0 = vld [vmem:[#allocation11 + $0x60] ss:$8 sps:$4 sm:$0xff]  }
 0x1e7   : > { %1637 = vmatpush3.bf16.msra.mxu1 %v1787_v50 }
 0x29d   : > { %v812_v42 = vpop.f32.mrb[0].mxu1 }
 0x29e   : > { %v813_v43 = vadd.f32 %v1475_v41, %v812_v42  ;;  %v1600_v44 = vpop.f32.mrb[1].mxu1 }
 0x29f   : > { %v815_v45 = vpop.f32.mrb[2].mxu1 }
 0x2a0   : > { %v818_v46 = vmax.f32 %v813_v43, 0.0  ;;  %v1601_v47 = vpop.f32.mrb[3].mxu1 }
 0x2a2   : > { %v819_v48 = vpack.c.bf16 %v818_v46, %v818_v46 }
 0x2a4   : > { %1619 = vmatmul.mubr.bf16.vlgmr.msra.gmra.mrb[4].mxu0 %v819_v48 }
 0x2a5   : > { %1155 = vmatpush1.bf16.msra.mxu0 %v1788_v51  ;;  %1186 = vmatprep.mubr.bf16.mxu0 %v2136_v11 }
 0x2a6   : > { %1156 = vmatprep.subr.bf16.mxu0 %v1793_v53 }
 0x2a9   : > { %1157 = vmatpush1.bf16.msra.mxu0 %v1791_v54 }
 0x2aa   : > { %1158 = vmatprep.subr.bf16.mxu0 %v1796_v55 }
 0x2ad   : > { %1159 = vmatpush1.bf16.msra.mxu0 %v1794_v56 }
 0x2ae   : > { %1160 = vmatprep.subr.bf16.mxu0 %v1799_v57 }
 0x2b1   : > { %1161 = vmatpush1.bf16.msra.mxu0 %v1797_v58 }
 0x2b2   : > { %1162 = vmatprep.subr.bf16.mxu0 %v1802_v59 }
 0x2b5   : > { %1163 = vmatpush1.bf16.msra.mxu0 %v1800_v60 }
 0x2b6   : > { %1164 = vmatprep.subr.bf16.mxu0 %v1805_v61 }
 0x2b9   : > { %1165 = vmatpush1.bf16.msra.mxu0 %v1803_v62 }
 0x2ba   : > { %1166 = vmatprep.subr.bf16.mxu0 %v1808_v63 }
 0x2bd   : > { %1167 = vmatpush1.bf16.msra.mxu0 %v1806_v0 }
 0x2be   : > { %1168 = vmatprep.subr.bf16.mxu0 %v1811_v9 }
 0x2c1   : > { %1169 = vmatpush1.bf16.msra.mxu0 %v1809_v10 }
 0x377   : > { %v925_v2 = vpop.f32.mrb[4].mxu0 }
 0x378   : > { %v926_v3 = vadd.f32 %v1484_v1, %v925_v2  ;;  %v1620_v4 = vpop.f32.mrb[5].mxu0 }
 0x379   : > { %v928_v5 = vpop.f32.mrb[6].mxu0 }
 0x37a   : > { %v931_v6 = vmax.f32 %v926_v3, 0.0  ;;  %v1621_v7 = vpop.f32.mrb[7].mxu0 }
 0x37c   : > { %v932_v8 = vpack.c.bf16 %v931_v6, %v931_v6 }
 0x37e   : > { %1639 = vmatmul.mubr.bf16.vlgmr.msra.gmra.mrb[4].mxu1 %v932_v8 }
 0x451   : > { %v1038_v13 = vpop.f32.mrb[4].mxu1 }
 0x452   : > { %v1039_v14 = vadd.f32 %v1493_v12, %v1038_v13  ;;  %v1640_v15 = vpop.f32.mrb[5].mxu1 }
 0x453   : > { %v1041_v16 = vpop.f32.mrb[6].mxu1 }
 0x454   : > { %v1044_v17 = vmax.f32 %v1039_v14, 0.0  ;;  %v1641_v18 = vpop.f32.mrb[7].mxu1 }
 0x456   : > { %v1045_v19 = vpack.c.bf16 %v1044_v17, %v1044_v17 }
 0x458   : > { %1187 = vmatmul.mubr.bf16.vlgmr.msra.gmra.mrb[8].mxu0 %v1045_v19 }
 0x52b   : > { %v1188_v27 = vpop.f32.mrb[8].mxu0 }
 0x52c   : > { %v2549_v28 = vadd.f32 %v1188_v27, %v1067_v25  ;;  %v1190_v29 = vpop.f32.mrb[9].mxu0 }
 0x52d   : > { %v1191_v30 = vadd.f32 %v1190_v29, %v1071_v26  ;;  %v1192_v31 = vpop.f32.mrb[10].mxu0 }
 0x52e   : > { %1202 = vst [vmem:[%s579_s11] sm:$0xff] %v2549_v28  ;;  %v1193_v32 = vpop.f32.mrb[11].mxu0 }
 0x52f   : > { %v1195_v33 = vmul.f32 0.5, %v1191_v30  ;;  %1203 = vst [vmem:[%s586_s8] sm:$0xff] %v1191_v30 }
 0x530   : > { %1997 = shalt.err (!%p1994_p6)
}
 0x531   : > { %s1998_s23 = scalar_lea.hbm %s2547_s0, 128  ;;  %s2002_s3 = scalar_lea.hbm %s2722_s25, 256 }
 0x532   : > { %p1999_p10 = scmp.ne.s32.totalorder %s2547_s0, %s1998_s23  ;;  %p2003_p5 = scmp.lt.u32.totalorder %s2547_s0, %s2722_s25 }
 0x533   : > { %p2004_p9 = scmp.lt.u32.totalorder %s2002_s3, %s1998_s23  ;;  %p2006_p1 = scmp.lt.u32.totalorder %s1998_s23, %s2547_s0 }
 0x534   : > { %p2000_p11 = pnand %p1999_p10, %p2724_p12 }
 0x535   : > { %p2005_p4 = por %p2004_p9, %p2003_p5 }
 0x536   : > { %p2001_p8 = pneg %p2000_p11 }
 0x537   : > { %p2007_p13 = por %p2006_p1, %p2005_p4 }
 0x539   : > { %p2008_p0 = pnand %p2007_p13, %p2001_p8 }
 0x53b   : > { %2011 = shalt.err (!%p2008_p0)
}
 0x53c   : > { %1665 = dma.vmem_to_hbm [thread:$0]  (%p2724_p12), %s2551_s13, 128, %s2547_s0, %s2563_s24  }
 0x53d   : > { %s2012_s18 = scalar_lea.vmem %s2560_s12, 128  ;;  %s2138_s21 = smov [#allocation16]  }
 0x53e   : > { %p2013_p2 = scmp.ne.s32.totalorder %s2560_s12, %s2012_s18  ;;  %s2016_s23 = sshll.u32 %s2138_s21, 4  ;;  %s2017_s23 = int_to_ptr.vmem [resolvable:$false] %s2016_s23 }
 0x53f   : > { %s2018_s11 = scalar_lea.vmem %s2017_s23, 256  ;;  %p2019_p10 = scmp.lt.s32.totalorder %s2560_s12, %s2017_s23 }
 0x540   : > { %p2014_p3 = pnand %p2013_p2, %p2724_p12  ;;  %p2020_p11 = scmp.lt.s32.totalorder %s2018_s11, %s2012_s18 }
 0x542   : > { %p2015_p6 = pneg %p2014_p3  ;;  %p2021_p8 = por %p2020_p11, %p2019_p10 }
 0x544   : > { %p2022_p5 = pnand %p2021_p8, %p2015_p6 }
 0x546   : > { %2025 = shalt.err (!%p2022_p5)
}
 0x547   : > { %s2026_s0 = scalar_lea.hbm %s2558_s2, 128  ;;  %s2030_s3 = scalar_lea.hbm %s2723_s20, 256 }
 0x548   : > { %p2027_p9 = scmp.ne.s32.totalorder %s2558_s2, %s2026_s0  ;;  %p2031_p13 = scmp.lt.u32.totalorder %s2558_s2, %s2723_s20 }
 0x549   : > { %p2032_p0 = scmp.lt.u32.totalorder %s2030_s3, %s2026_s0  ;;  %p2034_p3 = scmp.lt.u32.totalorder %s2026_s0, %s2558_s2 }
 0x54a   : > { %p2028_p4 = pnand %p2027_p9, %p2724_p12 }
 0x54b   : > { %p2033_p2 = por %p2032_p0, %p2031_p13 }
 0x54c   : > { %p2029_p1 = pneg %p2028_p4 }
 0x54d   : > { %p2035_p6 = por %p2034_p3, %p2033_p2 }
 0x54f   : > { %p2036_p10 = pnand %p2035_p6, %p2029_p1 }
 0x551   : > { %2039 = shalt.err (!%p2036_p10)
}
 0x552   : > { %1666 = dma.vmem_to_hbm [thread:$0]  (%p2724_p12), %s2560_s12, 128, %s2558_s2, %s2563_s24   ;;  %v1196_v34 = vmul.f32 1.442695, %v1195_v33 }
 0x553   : > { %s2735_s19 = smov (!%p587_p7, %s2236_s19), 1  ;;  %s2725_s11 = sld [smem:[#allocation30_spill]] }
 0x554   : > { %1812 = vpow2.f32 %v1196_v34  ;;  %s1465_s18 = sshll.u32 %s2735_s19, 3  ;;  %s572_s13 = scalar_lea.vmem [#allocation13], %s2460_s22 }
 0x555   : > { %s1228_s8 = sshll.u32 %s572_s13, 4  ;;  %s2726_s2 = sld [smem:[#allocation31_spill]]  ;;  %s2623_s8 = int_to_ptr.vmem [resolvable:$true] %s1228_s8 }
 0x556   : > { %s1205_s19 = scalar_lea.sflag [#allocation4], %s2457_s10  ;;  %s2040_s24 = scalar_lea.vmem %s2623_s8, 128 }
 0x557   : > { %p2041_p7 = scmp.ne.s32.totalorder %s2623_s8, %s2040_s24  ;;  %s2139_s22 = smov [#allocation13]  }
 0x558   : > { %s2044_s4 = sshll.u32 %s2139_s22, 4  ;;  %s2045_s4 = int_to_ptr.vmem [resolvable:$false] %s2044_s4 }
 0x559   : > { %s590_s0 = scalar_lea.vmem %s2725_s11, %s1465_s18  ;;  %p2042_p11 = pnand %p2041_p7, %p2724_p12 }
 0x55a   : > { %v1198_v35 = vld [vmem:[%s590_s0] sm:$0xff]  ;;  %s2046_s18 = scalar_lea.vmem %s2045_s4, 256  ;;  %p2047_p5 = scmp.lt.s32.totalorder %s2623_s8, %s2045_s4 }
 0x55b   : > { %s2621_s12 = scalar_lea.hbm %s2726_s2, %s2539_s26  ;;  %p2043_p8 = pneg %p2042_p11 }
 0x55c   : > { %p2048_p9 = scmp.lt.s32.totalorder %s2046_s18, %s2040_s24 }
 0x55e   : > { %v1813_v36 = vpop.eup %1812  ;;  %p2049_p4 = por %p2048_p9, %p2047_p5 }
 0x55f   : > { %v1199_v37 = vmul.f32 %v1813_v36, %v1198_v35 }
 0x560   : > { %p2050_p1 = pnand %p2049_p4, %p2043_p8 }
 0x561   : > { %v1200_v38 = vadd.f32 %v1199_v37, %v2549_v28 }
 0x563   : > { %1201 = vst [vmem:[%s572_s13] sm:$0xff] %v1200_v38 }
 0x564   : > { %2053 = shalt.err (!%p2050_p1)
}
 0x565   : > { %s2054_s10 = scalar_lea.hbm %s2621_s12, 128  ;;  %s2058_s23 = scalar_lea.hbm %s2726_s2, 256 }
 0x566   : > { %p2055_p13 = scmp.ne.s32.totalorder %s2621_s12, %s2054_s10  ;;  %p2059_p3 = scmp.lt.u32.totalorder %s2621_s12, %s2726_s2 }
 0x567   : > { %p2060_p6 = scmp.lt.u32.totalorder %s2058_s23, %s2054_s10  ;;  %p2062_p7 = scmp.lt.u32.totalorder %s2054_s10, %s2621_s12 }
 0x568   : > { %p2056_p0 = pnand %p2055_p13, %p2724_p12 }
 0x569   : > { %p2061_p10 = por %p2060_p6, %p2059_p3 }
 0x56a   : > { %p2057_p2 = pneg %p2056_p0 }
 0x56b   : > { %p2063_p11 = por %p2062_p7, %p2061_p10 }
 0x56d   : > { %p2064_p8 = pnand %p2063_p11, %p2057_p2 }
 0x56f   : > { %2067 = shalt.err (!%p2064_p8)
}
 0x570   : > { %1664 = dma.vmem_to_hbm [thread:$0]  (%p2724_p12), %s2623_s8, 128, %s2621_s12, %s1205_s19  }
 0x571 PF: > { %s1266_s13 = sand.u32 1, %s2110_s29   ;;  %p2727_p5 = scmp.ne.s32.totalorder %s2708_s17, 0 }
 0x572   : > { %p2728_p9 = scmp.ge.s32.totalorder %s2122_s16, 2  ;;  %s1267_s3 = scalar_lea.sflag [#allocation4], %s1266_s13 }
 0x574   : > { %p1691_p4 = pnand %p2728_p9, %p2727_p5 }
 0x576   : > { %2101 = dma.done.wait (!%p1691_p4), %s1267_s3, 128  }
 0x577   : > { %2103 = vsyncadd (!%p1691_p4), %s1267_s3, 4294967168  ;;  %s2729_s28 = sadd.s32 4294967294, %s2122_s16  }
 0x578   : > { %s1275_s24 = sand.u32 1, %s2729_s28  }
 0x579   : > { %s1276_s22 = scalar_lea.sflag [#allocation15], %s1275_s24 }
 0x57a   : > { %2105 = dma.done.wait (!%p1691_p4), %s1276_s22, 256  }
 0x57b   : > { %2107 = vsyncadd (!%p1691_p4), %s1276_s22, 4294967040  ;;  %p34_p12 = scmp.ge.s32.totalorder %s2385_s1, 4   ;;  %s2730_s29 = smov %s2114_s30 }
 0x57c   : > { %s2731_s30 = smov %s2118_s15  ;;  %s2732_s15 = smov %s2397_s14 }
 0x57d   : > { %s2733_s16 = smov %s2385_s1  ;;  %36 = sbr.rel (!%p34_p12) target bundleno = 22 (0x16), region = 168 }
 0x584   :  { %1290 = vsyncpa [#allocation3], 1 }
 0x585   :  { %1292 = vsyncpa [#allocation3 + $0x1], 1 }
 0x586   :  { %1293 = vsyncpa [#allocation6], 1 }
 0x587   :  { %1294 = vsyncpa [#allocation9], 1 }
 0x588   :  { %1295 = vsyncpa [#allocation12], 1 }
 0x589   :  { %1296 = vsyncpa [#allocation4], 1 }
 0x58a   :  { %1298 = vsyncpa [#allocation4 + $0x1], 1 }
 0x58b   :  { %1299 = vsyncpa [#allocation15], 1 }
 0x58c   :  { %1301 = vsyncpa [#allocation15 + $0x1], 1 }

// kernel: tpu_custom_call.1
= control target key start
LH: loop header
LB: loop body
LE: loop exit
PB: predicated region body
PF: predicated region fallthrough
CT: control target
= control target key end

     0   :  { %s2667_s0 = inlined_call_operand.hbm [shape: f32[16,128], index: 0, kind: input, shape index: {}]   ;;  %s2668_s1 = inlined_call_operand.hbm [shape: bf16[128,128], index: 1, kind: input, shape index: {}]   ;;  %s2669_s2 = inlined_call_operand.vmem [shape: f32[1,128], index: 2, kind: input, shape index: {}]   ;;  %s2670_s3 = inlined_call_operand.hbm [shape: bf16[128,128], index: 3, kind: input, shape index: {}]   ;;  %s2671_s4 = inlined_call_operand.vmem [shape: f32[1,128], index: 4, kind: input, shape index: {}]   ;;  %s2672_s5 = inlined_call_operand.hbm [shape: bf16[128,128], index: 5, kind: input, shape index: {}]   ;;  %s2673_s6 = inlined_call_operand.vmem [shape: f32[1,128], index: 6, kind: input, shape index: {}]   ;;  %s2674_s7 = inlined_call_operand.hbm [shape: bf16[128,128], index: 7, kind: input, shape index: {}]   ;;  %s2675_s8 = inlined_call_operand.vmem [shape: f32[1,128], index: 8, kind: input, shape index: {}]   ;;  %s2676_s9 = inlined_call_operand.hbm [shape: bf16[128,256], index: 9, kind: input, shape index: {}]   ;;  %s2677_s10 = inlined_call_operand.vmem [shape: f32[1,256], index: 10, kind: input, shape index: {}]   ;;  %s2678_s11 = inlined_call_operand.vmem [shape: f32[16,128], index: 11, kind: input, shape index: {}]   ;;  %s2679_s12 = inlined_call_operand.hbm [shape: f32[16,128], index: 12, kind: output, shape index: {0}]   ;;  %s2680_s13 = inlined_call_operand.hbm [shape: f32[16,128], index: 13, kind: output, shape index: {1}]   ;;  %s2681_s14 = inlined_call_operand.hbm [shape: f32[16,128], index: 14, kind: output, shape index: {2}]  }
   0x1   :  { %2689 = sst [smem:[#allocation23_spill]] %s2667_s0 }
   0x2   :  { %2690 = sst [smem:[#allocation24_spill]] %s2668_s1 }
   0x3   :  { %2691 = sst [smem:[#allocation25_spill]] %s2669_s2 }
   0x4   :  { %2692 = sst [smem:[#allocation26_spill]] %s2670_s3 }
   0x5   :  { %2693 = sst [smem:[#allocation27_spill]] %s2671_s4 }
   0x6   :  { %2694 = sst [smem:[#allocation28_spill]] %s2675_s8 }
   0x7   :  { %2695 = sst [smem:[#allocation29_spill]] %s2677_s10 }
   0x8   :  { %2696 = sst [smem:[#allocation30_spill]] %s2678_s11 }
   0x9   :  { %2697 = sst [smem:[#allocation31_spill]] %s2679_s12 }
   0xa   :  { %2698 = sst [smem:[#allocation32_spill]] %s2680_s13 }
   0xb   :  { %2699 = sst [smem:[#allocation33_spill]] %s2681_s14 }
   0xc   :  { %20 = vsyncpa [#allocation3], 0 }
   0xd   :  { %22 = vsyncpa [#allocation3 + $0x1], 0 }
   0xe   :  { %23 = vsyncpa [#allocation6], 0 }
   0xf   :  { %24 = vsyncpa [#allocation9], 0 }
  0x10   :  { %25 = vsyncpa [#allocation12], 0 }
  0x11   :  { %26 = vsyncpa [#allocation4], 0 }
  0x12   :  { %28 = vsyncpa [#allocation4 + $0x1], 0 }
  0x13   :  { %29 = vsyncpa [#allocation15], 0 }
  0x14   :  { %31 = vsyncpa [#allocation15 + $0x1], 0  ;;  %s2215_s29 = smov 0   ;;  %s2217_s30 = smov 0  }
  0x15   :  { %s2219_s15 = smov 0   ;;  %s2221_s16 = smov 0  }
  0x16 LB: > { %s2124_s17 = smov [#allocation5]   ;;  %s2236_s19 = sadd.s32 4294967295, %s2122_s16   ;;  %s2122_s16 = sphi %s2221_s16, %s2733_s16   ;;  %s2118_s15 = sphi %s2219_s15, %s2732_s15   ;;  %s2114_s30 = sphi %s2217_s30, %s2731_s30   ;;  %s2110_s29 = sphi %s2215_s29, %s2730_s29  }
  0x17   : > { %s394_s18 = sshll.u32 %s2124_s17, 4  ;;  %p1446_p0 = scmp.ge.s32.totalorder %s2122_s16, 1  ;;  %s2241_s18 = int_to_ptr.vmem [resolvable:$true] %s394_s18 }
  0x18   : > { %p2685_p1 = scmp.eq.s32.totalorder %s2236_s19, 0  ;;  %p382_p2 = scmp.lt.s32.totalorder %s2122_s16, 3 }
  0x19   : > { %s2125_s21 = smov [#allocation8]   ;;  %s2126_s24 = smov [#allocation7]  }
  0x1a   : > { %p2243_p3 = pnand %p1446_p0, %p382_p2  ;;  %s426_s22 = sshll.u32 %s2125_s21, 4  ;;  %s2256_s22 = int_to_ptr.vmem [resolvable:$true] %s426_s22 }
  0x1b   : > { %s410_s25 = sshll.u32 %s2126_s24, 4  ;;  %s2702_s1 = sld [smem:[#allocation24_spill]]  ;;  %s2258_s25 = int_to_ptr.vmem [resolvable:$true] %s410_s25 }
  0x1c   : > { %s2700_s20 = scalar_select %p2243_p3, 1, 0 }
  0x1d   : > { %p1670_p5 = pneg %p2243_p3 }
  0x1f   : > { %p2252_p6 = pnand %p1670_p5, %p2685_p1 }
  0x21   : > { %s1814_s28 = scalar_lea.hbm %s2702_s1, 1024  ;;  %p2268_p8 = pneg %p2252_p6 }
  0x22   : > { %p1815_p7 = scmp.ne.s32.totalorder %s2702_s1, %s1814_s28  ;;  %p1821_p11 = scmp.lt.u32.totalorder %s1814_s28, %s2702_s1 }
  0x24   : > { %p1817_p9 = pnand %p2268_p8, %p1815_p7 }
  0x26   : > { %p1818_p10 = pneg %p1817_p9 }
  0x28   : > { %p1823_p12 = pnand %p1821_p11, %p1818_p10 }
  0x2a   : > { %1826 = shalt.err (!%p1823_p12)
}
  0x2b   : > { %s1827_s12 = scalar_lea.vmem %s2241_s18, 1024  ;;  %p1835_p5 = scmp.lt.s32.totalorder %s2241_s18, %s2241_s18 }
  0x2c   : > { %p1828_p13 = scmp.ne.s32.totalorder %s2241_s18, %s1827_s12  ;;  %p1836_p4 = scmp.lt.s32.totalorder %s1827_s12, %s1827_s12 }
  0x2e   : > { %p1830_p0 = pnand %p1828_p13, %p2268_p8  ;;  %p1837_p7 = por %p1836_p4, %p1835_p5 }
  0x30   : > { %p1831_p2 = pneg %p1830_p0 }
  0x32   : > { %p1838_p9 = pnand %p1837_p7, %p1831_p2 }
  0x34   : > { %1841 = shalt.err (!%p1838_p9)
}
  0x35   : > { %s2127_s26 = smov 64   ;;  %s2128_s11 = smov 4  }
  0x36   : > { %1673 = dma.hbm_to_vmem [thread:$0]  (!%p2252_p6), %s2702_s1, 1024, %s2241_s18, [#allocation6], %s2127_s26, %s2127_s26, %s2128_s11  }
  0x37   : > { %s1842_s12 = scalar_lea.hbm %s2672_s5, 1024 }
  0x38   : > { %p1843_p4 = scmp.ne.s32.totalorder %s2672_s5, %s1842_s12  ;;  %p1849_p12 = scmp.lt.u32.totalorder %s1842_s12, %s2672_s5 }
  0x3a   : > { %p1845_p10 = pnand %p1843_p4, %p2268_p8 }
  0x3c   : > { %p1846_p11 = pneg %p1845_p10 }
  0x3e   : > { %p1851_p13 = pnand %p1849_p12, %p1846_p11 }
  0x40   : > { %1854 = shalt.err (!%p1851_p13)
}
  0x41   : > { %s1855_s18 = scalar_lea.vmem %s2256_s22, 1024  ;;  %p1863_p7 = scmp.lt.s32.totalorder %s2256_s22, %s2256_s22 }
  0x42   : > { %p1856_p0 = scmp.ne.s32.totalorder %s2256_s22, %s1855_s18  ;;  %p1864_p9 = scmp.lt.s32.totalorder %s1855_s18, %s1855_s18 }
  0x44   : > { %p1858_p2 = pnand %p1856_p0, %p2268_p8  ;;  %p1865_p4 = por %p1864_p9, %p1863_p7 }
  0x46   : > { %p1859_p5 = pneg %p1858_p2 }
  0x48   : > { %p1866_p10 = pnand %p1865_p4, %p1859_p5 }
  0x4a   : > { %1869 = shalt.err (!%p1866_p10)
}
  0x4b   : > { %1679 = dma.hbm_to_vmem [thread:$0]  (!%p2252_p6), %s2672_s5, 1024, %s2256_s22, [#allocation9], %s2127_s26, %s2127_s26, %s2128_s11  }
  0x4c   : > { %s2704_s3 = sld [smem:[#allocation26_spill]] }
  0x52   : > { %s1870_s27 = scalar_lea.hbm %s2704_s3, 1024 }
  0x53   : > { %p1871_p11 = scmp.ne.s32.totalorder %s2704_s3, %s1870_s27  ;;  %p1877_p0 = scmp.lt.u32.totalorder %s1870_s27, %s2704_s3 }
  0x55   : > { %p1873_p12 = pnand %p1871_p11, %p2268_p8 }
  0x57   : > { %p1874_p13 = pneg %p1873_p12 }
  0x59   : > { %p1879_p2 = pnand %p1877_p0, %p1874_p13 }
  0x5b   : > { %1882 = shalt.err (!%p1879_p2)
}
  0x5c   : > { %s1883_s22 = scalar_lea.vmem %s2258_s25, 1024  ;;  %p1891_p4 = scmp.lt.s32.totalorder %s2258_s25, %s2258_s25 }
  0x5d   : > { %p1884_p5 = scmp.ne.s32.totalorder %s2258_s25, %s1883_s22  ;;  %p1892_p10 = scmp.lt.s32.totalorder %s1883_s22, %s1883_s22 }
  0x5f   : > { %p1886_p7 = pnand %p1884_p5, %p2268_p8  ;;  %p1893_p11 = por %p1892_p10, %p1891_p4 }
  0x61   : > { %p1887_p9 = pneg %p1886_p7 }
  0x63   : > { %p1894_p12 = pnand %p1893_p11, %p1887_p9 }
  0x65   : > { %1897 = shalt.err (!%p1894_p12)
}
  0x66   : > { %1676 = dma.hbm_to_vmem [thread:$0]  (!%p2252_p6), %s2704_s3, 1024, %s2258_s25, [#allocation6], %s2127_s26, %s2127_s26, %s2128_s11  }
  0x67   : > { %s2129_s10 = smov [#allocation10]   ;;  %s2130_s14 = smov [#allocation11]  }
  0x68   : > { %s442_s13 = sshll.u32 %s2129_s10, 4  ;;  %s458_s27 = sshll.u32 %s2130_s14, 4  ;;  %s443_s13 = int_to_ptr.vmem [resolvable:$true] %s442_s13  ;;  %s459_s27 = int_to_ptr.vmem [resolvable:$true] %s458_s27 }
  0x69   : > { %s1898_s24 = scalar_lea.hbm %s2674_s7, 1024 }
  0x6a   : > { %p1899_p13 = scmp.ne.s32.totalorder %s2674_s7, %s1898_s24  ;;  %p1905_p5 = scmp.lt.u32.totalorder %s1898_s24, %s2674_s7 }
  0x6c   : > { %p1901_p0 = pnand %p1899_p13, %p2268_p8 }
  0x6e   : > { %p1902_p2 = pneg %p1901_p0 }
  0x70   : > { %p1907_p7 = pnand %p1905_p5, %p1902_p2 }
  0x72   : > { %1910 = shalt.err (!%p1907_p7)
}
  0x73   : > { %s1911_s25 = scalar_lea.vmem %s443_s13, 1024  ;;  %p1919_p11 = scmp.lt.s32.totalorder %s443_s13, %s443_s13 }
  0x74   : > { %p1912_p9 = scmp.ne.s32.totalorder %s443_s13, %s1911_s25  ;;  %p1920_p12 = scmp.lt.s32.totalorder %s1911_s25, %s1911_s25 }
  0x76   : > { %p1914_p4 = pnand %p1912_p9, %p2268_p8  ;;  %p1921_p1 = por %p1920_p12, %p1919_p11 }
  0x78   : > { %p1915_p10 = pneg %p1914_p4 }
  0x7a   : > { %p1922_p3 = pnand %p1921_p1, %p1915_p10 }
  0x7c   : > { %1925 = shalt.err (!%p1922_p3)
}
  0x7d   : > { %1682 = dma.hbm_to_vmem [thread:$0]  (!%p2252_p6), %s2674_s7, 1024, %s443_s13, [#allocation9], %s2127_s26, %s2127_s26, %s2128_s11  }
  0x7e   : > { %s1926_s28 = scalar_lea.hbm %s2676_s9, 2048 }
  0x7f   : > { %p1927_p1 = scmp.ne.s32.totalorder %s2676_s9, %s1926_s28  ;;  %p1933_p0 = scmp.lt.u32.totalorder %s1926_s28, %s2676_s9 }
  0x81   : > { %p1929_p3 = pnand %p1927_p1, %p2268_p8 }
  0x83   : > { %p1930_p13 = pneg %p1929_p3 }
  0x85   : > { %p1935_p2 = pnand %p1933_p0, %p1930_p13 }
  0x87   : > { %1938 = shalt.err (!%p1935_p2)
}
  0x88   : > { %s1939_s18 = scalar_lea.vmem %s459_s27, 2048  ;;  %p1947_p4 = scmp.lt.s32.totalorder %s459_s27, %s459_s27 }
  0x89   : > { %p1940_p5 = scmp.ne.s32.totalorder %s459_s27, %s1939_s18  ;;  %p1948_p10 = scmp.lt.s32.totalorder %s1939_s18, %s1939_s18 }
  0x8b   : > { %p1942_p7 = pnand %p1940_p5, %p2268_p8  ;;  %p1949_p11 = por %p1948_p10, %p1947_p4 }
  0x8d   : > { %p1943_p9 = pneg %p1942_p7 }
  0x8f   : > { %p1950_p12 = pnand %p1949_p11, %p1943_p9 }
  0x91   : > { %1953 = shalt.err (!%p1950_p12)
}
  0x92   : > { %s2131_s26 = smov 128   ;;  %s2132_s21 = smov 8  }
  0x93   : > { %1685 = dma.hbm_to_vmem [thread:$0]  (!%p2252_p6), %s2676_s9, 2048, %s459_s27, [#allocation12], %s2131_s26, %s2131_s26, %s2132_s21  }
  0x94   : > { %s2688_s25 = sadd.s32 4294967294, %s2122_s16   ;;  %s2385_s1 = sadd.s32 1, %s2122_s16  }
  0x95   : > { %s44_s8 = sadd.s32 1, %s2118_s15  ;;  %s41_s10 = ssub.s32 %s2122_s16, %s2385_s1 }
  0x96   : > { %p51_p8 = scmp.ne.s32.totalorder %s2118_s15, %s2114_s30  ;;  %p42_p1 = scmp.eq.s32.totalorder %s41_s10, 0 }
  0x97   : > { %p52_p3 = scmp.eq.s32.totalorder %s2122_s16, 0  ;;  %p57_p13 = scmp.ne.s32.totalorder %s2114_s30, %s2110_s29 }
  0x98   : > { %p317_p0 = scmp.eq.s32.totalorder %s2236_s19, 1  ;;  %p2705_p5 = scmp.eq.s32.totalorder %s2236_s19, 0 }
  0x99   : > { %s2397_s14 = scalar_select %p42_p1, %s2118_s15, %s44_s8  }
  0x9a   : > { %p53_p2 = por %p52_p3, %p51_p8  ;;  %p2401_p7 = por %p2705_p5, %p57_p13 }
  0x9b   : > { %p2405_p6 = por %p317_p0, %p51_p8  ;;  %p323_p9 = scmp.eq.s32.totalorder %s2688_s25, 1 }
  0x9c   : > { %p1705_p4 = scmp.lt.s32.totalorder %s2122_s16, 2  ;;  %s475_s28 = sand.u32 1, %s2118_s15  }
  0x9d   : > { %s2707_s27 = scalar_select %p2405_p6, 1, 0 }
  0x9e   : > { %p2413_p10 = por %p323_p9, %p57_p13  ;;  %s1453_s24 = sshll.u32 %s475_s28, 3 }
  0x9f   : > { %s1454_s12 = sshll.u32 %s2122_s16, 7  ;;  %s2709_s0 = sld [smem:[#allocation23_spill]] }
  0xa0   : > { %s2708_s17 = scalar_select %p2413_p10, 1, 0 }
  0xa1   : > { %s479_s21 = scalar_lea.vmem [#allocation2], %s1453_s24  ;;  %p2423_p11 = pnand %p1705_p4, %p53_p2 }
  0xa2   : > { %s486_s11 = sshll.u32 %s479_s21, 4  ;;  %s476_s8 = scalar_lea.sflag [#allocation3], %s475_s28  ;;  %s2427_s11 = int_to_ptr.vmem [resolvable:$true] %s486_s11 }
  0xa3   : > { %p1956_p8 = pneg %p2423_p11 }
  0xa5   : > { %s2421_s26 = scalar_lea.hbm %s2709_s0, %s1454_s12  ;;  %s1959_s22 = scalar_lea.hbm %s2709_s0, 256 }
  0xa6   : > { %s1954_s10 = scalar_lea.hbm %s2421_s26, 128  ;;  %p1960_p13 = scmp.lt.u32.totalorder %s2421_s26, %s2709_s0 }
  0xa7   : > { %p1955_p12 = scmp.ne.s32.totalorder %s2421_s26, %s1954_s10  ;;  %p1961_p0 = scmp.lt.u32.totalorder %s1959_s22, %s1954_s10 }
  0xa8   : > { %p1963_p5 = scmp.lt.u32.totalorder %s1954_s10, %s2421_s26 }
  0xa9   : > { %p1957_p1 = pnand %p1956_p8, %p1955_p12  ;;  %p1962_p2 = por %p1961_p0, %p1960_p13 }
  0xab   : > { %p1958_p3 = pneg %p1957_p1  ;;  %p1964_p9 = por %p1963_p5, %p1962_p2 }
  0xad   : > { %p1965_p4 = pnand %p1964_p9, %p1958_p3 }
  0xaf   : > { %1968 = shalt.err (!%p1965_p4)
}
  0xb0   : > { %s1969_s28 = scalar_lea.vmem %s2427_s11, 128  ;;  %s2133_s12 = smov [#allocation2]  }
  0xb1   : > { %p1970_p12 = scmp.ne.s32.totalorder %s2427_s11, %s1969_s28  ;;  %s1974_s24 = sshll.u32 %s2133_s12, 4  ;;  %s1975_s24 = int_to_ptr.vmem [resolvable:$false] %s1974_s24 }
  0xb2   : > { %s1976_s18 = scalar_lea.vmem %s1975_s24, 256  ;;  %p1977_p6 = scmp.lt.s32.totalorder %s2427_s11, %s1975_s24 }
  0xb3   : > { %p1972_p1 = pnand %p1970_p12, %p1956_p8  ;;  %p1978_p13 = scmp.lt.s32.totalorder %s1976_s18, %s1969_s28 }
  0xb5   : > { %p1973_p10 = pneg %p1972_p1  ;;  %p1979_p0 = por %p1978_p13, %p1977_p6 }
  0xb7   : > { %p1980_p2 = pnand %p1979_p0, %p1973_p10 }
  0xb9   : > { %1983 = shalt.err (!%p1980_p2)
}
  0xba   : > { %1689 = dma.hbm_to_vmem [thread:$0]  (!%p2423_p11), %s2421_s26, 128, %s2427_s11, %s476_s8  }
  0xbb   : > { %p2711_p3 = scmp.ne.s32.totalorder %s2700_s20, 0 }
  0xbc   : > { %s2457_s10 = sand.u32 (!%p2711_p3), 1, %s2114_s30  }
  0xbd   : > { %502 = sbr.rel (%p2711_p3) target bundleno = 1393 (0x571), region = 68  ;;  %s2460_s22 = sshll.u32 (!%p2711_p3), %s2457_s10, 3 }
  0xbe   : > { %s505_s21 = scalar_lea.sflag (!%p2711_p3), [#allocation3], %s2457_s10  ;;  %s508_s28 = scalar_lea.vmem (!%p2711_p3), [#allocation2], %s2460_s22 }
  0xc4   : > { %2085 = dma.done.wait (%p2401_p7), %s505_s21, 128  }
  0xc5   : > { %2087 = vsyncadd (%p2401_p7), %s505_s21, 4294967168  ;;  %p2712_p6 = scmp.eq.s32.totalorder %s2236_s19, 0 }
  0xc7   : > { %2089 = dma.done.wait (%p2712_p6), [#allocation6], 2048   ;;  %p2713_p10 = pmov %p2712_p6 }
  0xc8   : > { %p2714_p11 = pmov %p2712_p6 }
  0xc9   : > { %2091 = vsyncadd (%p2713_p10), [#allocation6], 4294965248 }
  0xca   : > { %2093 = dma.done.wait (%p2714_p11), [#allocation9], 2048   ;;  %p2715_p8 = pmov %p2712_p6 }
  0xcb   : > { %p2716_p5 = pmov %p2712_p6 }
  0xcc   : > { %2095 = vsyncadd (%p2715_p8), [#allocation9], 4294965248 }
  0xcd   : > { %2097 = dma.done.wait (%p2716_p5), [#allocation12], 2048   ;;  %p2717_p9 = pmov %p2716_p5 }
  0xce   : > { %v2134_v0 = vmov 0.0   ;;  %vm2135_vm0 = vmmov 0   ;;  %v1756_v1 = vld [vmem:[#allocation5] sm:$0xff]   ;;  %v1757_v2 = vld [vmem:[#allocation5 + $0x8] sm:$0xff]   ;;  %v1758_v3 = vld [vmem:[#allocation5 + $0x10] sm:$0xff]   ;;  %s2718_s2 = sld [smem:[#allocation25_spill]] }
  0xcf   : > { %2099 = vsyncadd (%p2717_p9), [#allocation12], 4294965248  ;;  %1562 = vmatprep.subr.bf16.mxu0 %v2134_v0  ;;  %1578 = vmatprep.mubr.msk.bf16.mxu0 %vm2135_vm0, %v2134_v0  ;;  %v1764_v4 = vld [vmem:[#allocation7] sm:$0xff]   ;;  %v1759_v5 = vld [vmem:[#allocation5 + $0x18] sm:$0xff]   ;;  %s2719_s4 = sld [smem:[#allocation27_spill]]  ;;  %s2720_s18 = sld [smem:[#allocation28_spill]] }
  0xd0   : > { %1582 = vmatprep.subr.bf16.mxu1 %v2134_v0  ;;  %1598 = vmatprep.mubr.msk.bf16.mxu1 %vm2135_vm0, %v2134_v0  ;;  %v1765_v6 = vld [vmem:[#allocation7 + $0x8] sm:$0xff]   ;;  %v1760_v7 = vld [vmem:[#allocation5 + $0x20] sm:$0xff]   ;;  %v1766_v8 = vld [vmem:[#allocation7 + $0x10] sm:$0xff]   ;;  %s2721_s20 = sld [smem:[#allocation29_spill]]  ;;  %s1209_s23 = sand.u32 1, %s2236_s19  }
  0xd1   : > { %1563 = vmatpush3.bf16.msra.mxu0 %v1756_v1  ;;  %1583 = vmatpush3.bf16.msra.mxu1 %v1764_v4  ;;  %v1761_v9 = vld [vmem:[#allocation5 + $0x28] sm:$0xff]   ;;  %v1767_v10 = vld [vmem:[#allocation7 + $0x18] sm:$0xff]   ;;  %v1762_v11 = vld [vmem:[#allocation5 + $0x30] sm:$0xff]   ;;  %s2539_s26 = sshll.u32 %s2236_s19, 7  ;;  %s579_s11 = scalar_lea.vmem [#allocation14], %s2460_s22 }
  0xd2   : > { %1564 = vmatprep.subr.bf16.mxu0 %v2134_v0  ;;  %1584 = vmatprep.subr.bf16.mxu1 %v2134_v0  ;;  %v1768_v12 = vld [vmem:[#allocation7 + $0x20] sm:$0xff]   ;;  %v1763_v13 = vld [vmem:[#allocation5 + $0x38] sm:$0xff]   ;;  %v1769_v15 = vld [vmem:[#allocation7 + $0x28] sm:$0xff]   ;;  %s1241_s13 = sshll.u32 %s579_s11, 4  ;;  %s586_s8 = scalar_lea.vmem [#allocation16], %s2460_s22  ;;  %s2551_s13 = int_to_ptr.vmem [resolvable:$true] %s1241_s13 }
  0xd3   : > { %v592_v14 = vld [vmem:[%s508_s28] sm:$0xff]  ;;  %v1772_v19 = vld [vmem:[#allocation8] sm:$0xff]   ;;  %v1773_v20 = vld [vmem:[#allocation8 + $0x8] sm:$0xff]   ;;  %s1254_s12 = sshll.u32 %s586_s8, 4  ;;  %s2722_s25 = sld [smem:[#allocation32_spill]]  ;;  %s2560_s12 = int_to_ptr.vmem [resolvable:$true] %s1254_s12 }
  0xd4   : > { %v593_v16 = vpack.c.bf16 %v592_v14, %v592_v14  ;;  %v1770_v17 = vld [vmem:[#allocation7 + $0x30] sm:$0xff]   ;;  %v1771_v18 = vld [vmem:[#allocation7 + $0x38] sm:$0xff]   ;;  %v1776_v23 = vld [vmem:[#allocation8 + $0x20] sm:$0xff]   ;;  %p587_p7 = scmp.lt.s32.totalorder %s2236_s19, 1  ;;  %s2563_s24 = scalar_lea.sflag [#allocation15], %s1209_s23 }
  0xd5   : > { %1565 = vmatpush3.bf16.msra.mxu0 %v1757_v2  ;;  %1585 = vmatpush3.bf16.msra.mxu1 %v1765_v6  ;;  %v1774_v21 = vld [vmem:[#allocation8 + $0x10] sm:$0xff]   ;;  %v1775_v22 = vld [vmem:[#allocation8 + $0x18] sm:$0xff]   ;;  %v1777_v24 = vld [vmem:[#allocation8 + $0x28] sm:$0xff]   ;;  %p2724_p12 = scmp.ne.s32.totalorder %s2707_s27, 0  ;;  %s2137_s3 = smov [#allocation14]  }
  0xd6   : > { %1566 = vmatprep.subr.bf16.mxu0 %v2134_v0  ;;  %1586 = vmatprep.subr.bf16.mxu1 %v2134_v0  ;;  %v1466_v25 = vld [vmem:[%s2718_s2] ss:$0 sm:$0xff]  ;;  %v1779_v34 = vld [vmem:[#allocation8 + $0x38] sm:$0xff]   ;;  %v1780_v35 = vld [vmem:[#allocation10] sm:$0xff]  }
  0xd7   : > { %v1778_v33 = vld [vmem:[#allocation8 + $0x30] sm:$0xff]   ;;  %v1781_v36 = vld [vmem:[#allocation10 + $0x8] sm:$0xff]   ;;  %v1783_v38 = vld [vmem:[#allocation10 + $0x18] sm:$0xff]  }
  0xd8   : > { %v1782_v37 = vld [vmem:[#allocation10 + $0x10] sm:$0xff]   ;;  %v1784_v39 = vld [vmem:[#allocation10 + $0x20] sm:$0xff]   ;;  %v1785_v40 = vld [vmem:[#allocation10 + $0x28] sm:$0xff]  }
  0xd9   : > { %1567 = vmatpush3.bf16.msra.mxu0 %v1758_v3  ;;  %1587 = vmatpush3.bf16.msra.mxu1 %v1766_v8  ;;  %v1475_v41 = vld [vmem:[%s2719_s4] ss:$0 sm:$0xff]  ;;  %v1787_v50 = vld [vmem:[#allocation10 + $0x38] sm:$0xff]   ;;  %v1788_v51 = vld [vmem:[#allocation11] ss:$8 sps:$4 sm:$0xff]   ;;  %s2547_s0 = scalar_lea.hbm %s2722_s25, %s2539_s26  ;;  %s1988_s4 = sshll.u32 %s2137_s3, 4  ;;  %s1989_s4 = int_to_ptr.vmem [resolvable:$false] %s1988_s4 }
  0xda   : > { %1568 = vmatprep.subr.bf16.mxu0 %v2134_v0  ;;  %1588 = vmatprep.subr.bf16.mxu1 %v2134_v0  ;;  %v1786_v49 = vld [vmem:[#allocation10 + $0x30] sm:$0xff]   ;;  %v1790_v52 = vld [vmem:[#allocation11 + $0x4] ss:$8 sps:$4 sm:$0xff]   ;;  %v1794_v56 = vld [vmem:[#allocation11 + $0x20] ss:$8 sps:$4 sm:$0xff]   ;;  %s1990_s21 = scalar_lea.vmem %s1989_s4, 256  ;;  %p1991_p0 = scmp.lt.s32.totalorder %s2551_s13, %s1989_s4 }
  0xdb   : > { %v1793_v53 = vld [vmem:[#allocation11 + $0x14] ss:$8 sps:$4 sm:$0xff]   ;;  %v1791_v54 = vld [vmem:[#allocation11 + $0x10] ss:$8 sps:$4 sm:$0xff]   ;;  %v1796_v55 = vld [vmem:[#allocation11 + $0x24] ss:$8 sps:$4 sm:$0xff]  }
  0xdc   : > { %v1799_v57 = vld [vmem:[#allocation11 + $0x34] ss:$8 sps:$4 sm:$0xff]   ;;  %v1797_v58 = vld [vmem:[#allocation11 + $0x30] ss:$8 sps:$4 sm:$0xff]   ;;  %v1802_v59 = vld [vmem:[#allocation11 + $0x44] ss:$8 sps:$4 sm:$0xff]  }
  0xdd   : > { %1569 = vmatpush3.bf16.msra.mxu0 %v1759_v5  ;;  %1589 = vmatpush3.bf16.msra.mxu1 %v1767_v10  ;;  %v1800_v60 = vld [vmem:[#allocation11 + $0x40] ss:$8 sps:$4 sm:$0xff]   ;;  %v1805_v61 = vld [vmem:[#allocation11 + $0x54] ss:$8 sps:$4 sm:$0xff]   ;;  %v1803_v62 = vld [vmem:[#allocation11 + $0x50] ss:$8 sps:$4 sm:$0xff]  }
  0xde   : > { %1570 = vmatprep.subr.bf16.mxu0 %v2134_v0  ;;  %1590 = vmatprep.subr.bf16.mxu1 %v2134_v0  ;;  %v1808_v63 = vld [vmem:[#allocation11 + $0x64] ss:$8 sps:$4 sm:$0xff]   ;;  %v1484_v1 = vld [vmem:[%s2673_s6] ss:$0 sm:$0xff] }
  0xdf   : > { %v1809_v10 = vld [vmem:[#allocation11 + $0x70] ss:$8 sps:$4 sm:$0xff]  }
  0xe1   : > { %1571 = vmatpush3.bf16.msra.mxu0 %v1760_v7  ;;  %1591 = vmatpush3.bf16.msra.mxu1 %v1768_v12  ;;  %v1493_v12 = vld [vmem:[%s2720_s18] ss:$0 sm:$0xff]  ;;  %s1984_s18 = scalar_lea.vmem %s2551_s13, 128 }
  0xe2   : > { %1572 = vmatprep.subr.bf16.mxu0 %v2134_v0  ;;  %1592 = vmatprep.subr.bf16.mxu1 %v2134_v0  ;;  %p1985_p4 = scmp.ne.s32.totalorder %s2551_s13, %s1984_s18  ;;  %p1992_p2 = scmp.lt.s32.totalorder %s1990_s21, %s1984_s18 }
  0xe4   : > { %p1986_p1 = pnand %p1985_p4, %p2724_p12  ;;  %p1993_p3 = por %p1992_p2, %p1991_p0 }
  0xe5   : > { %1573 = vmatpush3.bf16.msra.mxu0 %v1761_v9  ;;  %1593 = vmatpush3.bf16.msra.mxu1 %v1769_v15  ;;  %v1811_v9 = vld [vmem:[#allocation11 + $0x74] ss:$8 sps:$4 sm:$0xff]  }
  0xe6   : > { %1574 = vmatprep.subr.bf16.mxu0 %v2134_v0  ;;  %1594 = vmatprep.subr.bf16.mxu1 %v2134_v0  ;;  %p1987_p13 = pneg %p1986_p1 }
  0xe8   : > { %p1994_p6 = pnand %p1993_p3, %p1987_p13 }
  0xe9   : > { %1575 = vmatpush3.bf16.msra.mxu0 %v1762_v11  ;;  %1595 = vmatpush3.bf16.msra.mxu1 %v1770_v17  ;;  %v2136_v11 = vmov 0  }
  0xea   : > { %1576 = vmatprep.subr.bf16.mxu0 %v2134_v0  ;;  %1596 = vmatprep.subr.bf16.mxu1 %v2134_v0 }
  0xed   : > { %1577 = vmatpush3.bf16.msra.mxu0 %v1763_v13  ;;  %1597 = vmatpush3.bf16.msra.mxu1 %v1771_v18 }
  0xee   : > { %1602 = vmatprep.subr.bf16.mxu0 %v2134_v0  ;;  %1622 = vmatprep.subr.bf16.mxu1 %v2134_v0 }
  0xf0   : > { %1579 = vmatmul.mubr.bf16.vlgmr.msra.gmra.mrb[0].mxu0 %v593_v16 }
  0xf1   : > { %1618 = vmatprep.mubr.msk.bf16.mxu0 %vm2135_vm0, %v2134_v0  ;;  %1603 = vmatpush3.bf16.msra.mxu0 %v1772_v19 }
  0xf2   : > { %1604 = vmatprep.subr.bf16.mxu0 %v2134_v0 }
  0xf5   : > { %1605 = vmatpush3.bf16.msra.mxu0 %v1773_v20  ;;  %v1064_v20 = vlaneseq }
  0xf6   : > { %1606 = vmatprep.subr.bf16.mxu0 %v2134_v0 }
  0xf9   : > { %1607 = vmatpush3.bf16.msra.mxu0 %v1774_v21  ;;  %v1065_v21 = vshrl.u32 %v1064_v20, 7 }
  0xfa   : > { %1608 = vmatprep.subr.bf16.mxu0 %v2134_v0 }
  0xfd   : > { %1609 = vmatpush3.bf16.msra.mxu0 %v1775_v22  ;;  %v1066_v22 = vsub.s32 0, %v1065_v21 }
  0xfe   : > { %1610 = vmatprep.subr.bf16.mxu0 %v2134_v0 }
 0x101   : > { %1611 = vmatpush3.bf16.msra.mxu0 %v1776_v23  ;;  %v1062_v23 = vld [vmem:[%s2721_s20] sm:$0x3]  ;;  %s2723_s20 = sld [smem:[#allocation33_spill]] }
 0x102   : > { %1612 = vmatprep.subr.bf16.mxu0 %v2134_v0 }
 0x105   : > { %1613 = vmatpush3.bf16.msra.mxu0 %v1777_v24  ;;  %v1070_v24 = vsub.s32 1, %v1065_v21 }
 0x106   : > { %1614 = vmatprep.subr.bf16.mxu0 %v2134_v0 }
 0x107   : > { %s2558_s2 = scalar_lea.hbm %s2723_s20, %s2539_s26 }
 0x109   : > { %1615 = vmatpush3.bf16.msra.mxu0 %v1778_v33 }
 0x10a   : > { %1616 = vmatprep.subr.bf16.mxu0 %v2134_v0 }
 0x10d   : > { %1617 = vmatpush3.bf16.msra.mxu0 %v1779_v34 }
 0x10e   : > { %1154 = vmatprep.subr.bf16.mxu0 %v1790_v52 }
 0x1c3   : > { %v699_v26 = vpop.f32.mrb[0].mxu0 }
 0x1c4   : > { %v700_v27 = vadd.f32 %v1466_v25, %v699_v26  ;;  %v1580_v28 = vpop.f32.mrb[1].mxu0  ;;  %v1067_v25 = vrot.slane %v1062_v23, %v1066_v22  ;;  %v1071_v26 = vrot.slane %v1062_v23, %v1070_v24 }
 0x1c5   : > { %v702_v29 = vpop.f32.mrb[2].mxu0 }
 0x1c6   : > { %v705_v30 = vmax.f32 %v700_v27, 0.0  ;;  %v1581_v31 = vpop.f32.mrb[3].mxu0 }
 0x1c8   : > { %v706_v32 = vpack.c.bf16 %v705_v30, %v705_v30 }
 0x1ca   : > { %1599 = vmatmul.mubr.bf16.vlgmr.msra.gmra.mrb[0].mxu1 %v706_v32 }
 0x1cb   : > { %1638 = vmatprep.mubr.msk.bf16.mxu1 %vm2135_vm0, %v2134_v0  ;;  %1623 = vmatpush3.bf16.msra.mxu1 %v1780_v35 }
 0x1cc   : > { %1624 = vmatprep.subr.bf16.mxu1 %v2134_v0 }
 0x1cf   : > { %1625 = vmatpush3.bf16.msra.mxu1 %v1781_v36 }
 0x1d0   : > { %1626 = vmatprep.subr.bf16.mxu1 %v2134_v0 }
 0x1d3   : > { %1627 = vmatpush3.bf16.msra.mxu1 %v1782_v37 }
 0x1d4   : > { %1628 = vmatprep.subr.bf16.mxu1 %v2134_v0 }
 0x1d7   : > { %1629 = vmatpush3.bf16.msra.mxu1 %v1783_v38 }
 0x1d8   : > { %1630 = vmatprep.subr.bf16.mxu1 %v2134_v0 }
 0x1db   : > { %1631 = vmatpush3.bf16.msra.mxu1 %v1784_v39 }
 0x1dc   : > { %1632 = vmatprep.subr.bf16.mxu1 %v2134_v0 }
 0x1df   : > { %1633 = vmatpush3.bf16.msra.mxu1 %v1785_v40 }
 0x1e0   : > { %1634 = vmatprep.subr.bf16.mxu1 %v2134_v0 }
 0x1e3   : > { %1635 = vmatpush3.bf16.msra.mxu1 %v1786_v49 }
 0x1e4   : > { %1636 = vmatprep.subr.bf16.mxu1 %v2134_v0  ;;  %v1806_v0 = vld [vmem:[#allocation11 + $0x60] ss:$8 sps:$4 sm:$0xff]  }
 0x1e7   : > { %1637 = vmatpush3.bf16.msra.mxu1 %v1787_v50 }
 0x29d   : > { %v812_v42 = vpop.f32.mrb[0].mxu1 }
 0x29e   : > { %v813_v43 = vadd.f32 %v1475_v41, %v812_v42  ;;  %v1600_v44 = vpop.f32.mrb[1].mxu1 }
 0x29f   : > { %v815_v45 = vpop.f32.mrb[2].mxu1 }
 0x2a0   : > { %v818_v46 = vmax.f32 %v813_v43, 0.0  ;;  %v1601_v47 = vpop.f32.mrb[3].mxu1 }
 0x2a2   : > { %v819_v48 = vpack.c.bf16 %v818_v46, %v818_v46 }
 0x2a4   : > { %1619 = vmatmul.mubr.bf16.vlgmr.msra.gmra.mrb[4].mxu0 %v819_v48 }
 0x2a5   : > { %1155 = vmatpush1.bf16.msra.mxu0 %v1788_v51  ;;  %1186 = vmatprep.mubr.bf16.mxu0 %v2136_v11 }
 0x2a6   : > { %1156 = vmatprep.subr.bf16.mxu0 %v1793_v53 }
 0x2a9   : > { %1157 = vmatpush1.bf16.msra.mxu0 %v1791_v54 }
 0x2aa   : > { %1158 = vmatprep.subr.bf16.mxu0 %v1796_v55 }
 0x2ad   : > { %1159 = vmatpush1.bf16.msra.mxu0 %v1794_v56 }
 0x2ae   : > { %1160 = vmatprep.subr.bf16.mxu0 %v1799_v57 }
 0x2b1   : > { %1161 = vmatpush1.bf16.msra.mxu0 %v1797_v58 }
 0x2b2   : > { %1162 = vmatprep.subr.bf16.mxu0 %v1802_v59 }
 0x2b5   : > { %1163 = vmatpush1.bf16.msra.mxu0 %v1800_v60 }
 0x2b6   : > { %1164 = vmatprep.subr.bf16.mxu0 %v1805_v61 }
 0x2b9   : > { %1165 = vmatpush1.bf16.msra.mxu0 %v1803_v62 }
 0x2ba   : > { %1166 = vmatprep.subr.bf16.mxu0 %v1808_v63 }
 0x2bd   : > { %1167 = vmatpush1.bf16.msra.mxu0 %v1806_v0 }
 0x2be   : > { %1168 = vmatprep.subr.bf16.mxu0 %v1811_v9 }
 0x2c1   : > { %1169 = vmatpush1.bf16.msra.mxu0 %v1809_v10 }
 0x377   : > { %v925_v2 = vpop.f32.mrb[4].mxu0 }
 0x378   : > { %v926_v3 = vadd.f32 %v1484_v1, %v925_v2  ;;  %v1620_v4 = vpop.f32.mrb[5].mxu0 }
 0x379   : > { %v928_v5 = vpop.f32.mrb[6].mxu0 }
 0x37a   : > { %v931_v6 = vmax.f32 %v926_v3, 0.0  ;;  %v1621_v7 = vpop.f32.mrb[7].mxu0 }
 0x37c   : > { %v932_v8 = vpack.c.bf16 %v931_v6, %v931_v6 }
 0x37e   : > { %1639 = vmatmul.mubr.bf16.vlgmr.msra.gmra.mrb[4].mxu1 %v932_v8 }
 0x451   : > { %v1038_v13 = vpop.f32.mrb[4].mxu1 }
 0x452   : > { %v1039_v14 = vadd.f32 %v1493_v12, %v1038_v13  ;;  %v1640_v15 = vpop.f32.mrb[5].mxu1 }
 0x453   : > { %v1041_v16 = vpop.f32.mrb[6].mxu1 }
 0x454   : > { %v1044_v17 = vmax.f32 %v1039_v14, 0.0  ;;  %v1641_v18 = vpop.f32.mrb[7].mxu1 }
 0x456   : > { %v1045_v19 = vpack.c.bf16 %v1044_v17, %v1044_v17 }
 0x458   : > { %1187 = vmatmul.mubr.bf16.vlgmr.msra.gmra.mrb[8].mxu0 %v1045_v19 }
 0x52b   : > { %v1188_v27 = vpop.f32.mrb[8].mxu0 }
 0x52c   : > { %v2549_v28 = vadd.f32 %v1188_v27, %v1067_v25  ;;  %v1190_v29 = vpop.f32.mrb[9].mxu0 }
 0x52d   : > { %v1191_v30 = vadd.f32 %v1190_v29, %v1071_v26  ;;  %v1192_v31 = vpop.f32.mrb[10].mxu0 }
 0x52e   : > { %1202 = vst [vmem:[%s579_s11] sm:$0xff] %v2549_v28  ;;  %v1193_v32 = vpop.f32.mrb[11].mxu0 }
 0x52f   : > { %v1195_v33 = vmul.f32 0.5, %v1191_v30  ;;  %1203 = vst [vmem:[%s586_s8] sm:$0xff] %v1191_v30 }
 0x530   : > { %1997 = shalt.err (!%p1994_p6)
}
 0x531   : > { %s1998_s23 = scalar_lea.hbm %s2547_s0, 128  ;;  %s2002_s3 = scalar_lea.hbm %s2722_s25, 256 }
 0x532   : > { %p1999_p10 = scmp.ne.s32.totalorder %s2547_s0, %s1998_s23  ;;  %p2003_p5 = scmp.lt.u32.totalorder %s2547_s0, %s2722_s25 }
 0x533   : > { %p2004_p9 = scmp.lt.u32.totalorder %s2002_s3, %s1998_s23  ;;  %p2006_p1 = scmp.lt.u32.totalorder %s1998_s23, %s2547_s0 }
 0x534   : > { %p2000_p11 = pnand %p1999_p10, %p2724_p12 }
 0x535   : > { %p2005_p4 = por %p2004_p9, %p2003_p5 }
 0x536   : > { %p2001_p8 = pneg %p2000_p11 }
 0x537   : > { %p2007_p13 = por %p2006_p1, %p2005_p4 }
 0x539   : > { %p2008_p0 = pnand %p2007_p13, %p2001_p8 }
 0x53b   : > { %2011 = shalt.err (!%p2008_p0)
}
 0x53c   : > { %1665 = dma.vmem_to_hbm [thread:$0]  (%p2724_p12), %s2551_s13, 128, %s2547_s0, %s2563_s24  }
 0x53d   : > { %s2012_s18 = scalar_lea.vmem %s2560_s12, 128  ;;  %s2138_s21 = smov [#allocation16]  }
 0x53e   : > { %p2013_p2 = scmp.ne.s32.totalorder %s2560_s12, %s2012_s18  ;;  %s2016_s23 = sshll.u32 %s2138_s21, 4  ;;  %s2017_s23 = int_to_ptr.vmem [resolvable:$false] %s2016_s23 }
 0x53f   : > { %s2018_s11 = scalar_lea.vmem %s2017_s23, 256  ;;  %p2019_p10 = scmp.lt.s32.totalorder %s2560_s12, %s2017_s23 }
 0x540   : > { %p2014_p3 = pnand %p2013_p2, %p2724_p12  ;;  %p2020_p11 = scmp.lt.s32.totalorder %s2018_s11, %s2012_s18 }
 0x542   : > { %p2015_p6 = pneg %p2014_p3  ;;  %p2021_p8 = por %p2020_p11, %p2019_p10 }
 0x544   : > { %p2022_p5 = pnand %p2021_p8, %p2015_p6 }
 0x546   : > { %2025 = shalt.err (!%p2022_p5)
}
 0x547   : > { %s2026_s0 = scalar_lea.hbm %s2558_s2, 128  ;;  %s2030_s3 = scalar_lea.hbm %s2723_s20, 256 }
 0x548   : > { %p2027_p9 = scmp.ne.s32.totalorder %s2558_s2, %s2026_s0  ;;  %p2031_p13 = scmp.lt.u32.totalorder %s2558_s2, %s2723_s20 }
 0x549   : > { %p2032_p0 = scmp.lt.u32.totalorder %s2030_s3, %s2026_s0  ;;  %p2034_p3 = scmp.lt.u32.totalorder %s2026_s0, %s2558_s2 }
 0x54a   : > { %p2028_p4 = pnand %p2027_p9, %p2724_p12 }
 0x54b   : > { %p2033_p2 = por %p2032_p0, %p2031_p13 }
 0x54c   : > { %p2029_p1 = pneg %p2028_p4 }
 0x54d   : > { %p2035_p6 = por %p2034_p3, %p2033_p2 }
 0x54f   : > { %p2036_p10 = pnand %p2035_p6, %p2029_p1 }
 0x551   : > { %2039 = shalt.err (!%p2036_p10)
}
 0x552   : > { %1666 = dma.vmem_to_hbm [thread:$0]  (%p2724_p12), %s2560_s12, 128, %s2558_s2, %s2563_s24   ;;  %v1196_v34 = vmul.f32 1.442695, %v1195_v33 }
 0x553   : > { %s2735_s19 = smov (!%p587_p7, %s2236_s19), 1  ;;  %s2725_s11 = sld [smem:[#allocation30_spill]] }
 0x554   : > { %1812 = vpow2.f32 %v1196_v34  ;;  %s1465_s18 = sshll.u32 %s2735_s19, 3  ;;  %s572_s13 = scalar_lea.vmem [#allocation13], %s2460_s22 }
 0x555   : > { %s1228_s8 = sshll.u32 %s572_s13, 4  ;;  %s2726_s2 = sld [smem:[#allocation31_spill]]  ;;  %s2623_s8 = int_to_ptr.vmem [resolvable:$true] %s1228_s8 }
 0x556   : > { %s1205_s19 = scalar_lea.sflag [#allocation4], %s2457_s10  ;;  %s2040_s24 = scalar_lea.vmem %s2623_s8, 128 }
 0x557   : > { %p2041_p7 = scmp.ne.s32.totalorder %s2623_s8, %s2040_s24  ;;  %s2139_s22 = smov [#allocation13]  }
 0x558   : > { %s2044_s4 = sshll.u32 %s2139_s22, 4  ;;  %s2045_s4 = int_to_ptr.vmem [resolvable:$false] %s2044_s4 }
 0x559   : > { %s590_s0 = scalar_lea.vmem %s2725_s11, %s1465_s18  ;;  %p2042_p11 = pnand %p2041_p7, %p2724_p12 }
 0x55a   : > { %v1198_v35 = vld [vmem:[%s590_s0] sm:$0xff]  ;;  %s2046_s18 = scalar_lea.vmem %s2045_s4, 256  ;;  %p2047_p5 = scmp.lt.s32.totalorder %s2623_s8, %s2045_s4 }
 0x55b   : > { %s2621_s12 = scalar_lea.hbm %s2726_s2, %s2539_s26  ;;  %p2043_p8 = pneg %p2042_p11 }
 0x55c   : > { %p2048_p9 = scmp.lt.s32.totalorder %s2046_s18, %s2040_s24 }
 0x55e   : > { %v1813_v36 = vpop.eup %1812  ;;  %p2049_p4 = por %p2048_p9, %p2047_p5 }
 0x55f   : > { %v1199_v37 = vmul.f32 %v1813_v36, %v1198_v35 }
 0x560   : > { %p2050_p1 = pnand %p2049_p4, %p2043_p8 }
 0x561   : > { %v1200_v38 = vadd.f32 %v1199_v37, %v2549_v28 }
 0x563   : > { %1201 = vst [vmem:[%s572_s13] sm:$0xff] %v1200_v38 }
 0x564   : > { %2053 = shalt.err (!%p2050_p1)
}
 0x565   : > { %s2054_s10 = scalar_lea.hbm %s2621_s12, 128  ;;  %s2058_s23 = scalar_lea.hbm %s2726_s2, 256 }
 0x566   : > { %p2055_p13 = scmp.ne.s32.totalorder %s2621_s12, %s2054_s10  ;;  %p2059_p3 = scmp.lt.u32.totalorder %s2621_s12, %s2726_s2 }
 0x567   : > { %p2060_p6 = scmp.lt.u32.totalorder %s2058_s23, %s2054_s10  ;;  %p2062_p7 = scmp.lt.u32.totalorder %s2054_s10, %s2621_s12 }
 0x568   : > { %p2056_p0 = pnand %p2055_p13, %p2724_p12 }
 0x569   : > { %p2061_p10 = por %p2060_p6, %p2059_p3 }
 0x56a   : > { %p2057_p2 = pneg %p2056_p0 }
 0x56b   : > { %p2063_p11 = por %p2062_p7, %p2061_p10 }
 0x56d   : > { %p2064_p8 = pnand %p2063_p11, %p2057_p2 }
 0x56f   : > { %2067 = shalt.err (!%p2064_p8)
}
 0x570   : > { %1664 = dma.vmem_to_hbm [thread:$0]  (%p2724_p12), %s2623_s8, 128, %s2621_s12, %s1205_s19  }
 0x571 PF: > { %s1266_s13 = sand.u32 1, %s2110_s29   ;;  %p2727_p5 = scmp.ne.s32.totalorder %s2708_s17, 0 }
 0x572   : > { %p2728_p9 = scmp.ge.s32.totalorder %s2122_s16, 2  ;;  %s1267_s3 = scalar_lea.sflag [#allocation4], %s1266_s13 }
 0x574   : > { %p1691_p4 = pnand %p2728_p9, %p2727_p5 }
 0x576   : > { %2101 = dma.done.wait (!%p1691_p4), %s1267_s3, 128  }
 0x577   : > { %2103 = vsyncadd (!%p1691_p4), %s1267_s3, 4294967168  ;;  %s2729_s28 = sadd.s32 4294967294, %s2122_s16  }
 0x578   : > { %s1275_s24 = sand.u32 1, %s2729_s28  }
 0x579   : > { %s1276_s22 = scalar_lea.sflag [#allocation15], %s1275_s24 }
 0x57a   : > { %2105 = dma.done.wait (!%p1691_p4), %s1276_s22, 256  }
 0x57b   : > { %2107 = vsyncadd (!%p1691_p4), %s1276_s22, 4294967040  ;;  %p34_p12 = scmp.ge.s32.totalorder %s2385_s1, 4   ;;  %s2730_s29 = smov %s2114_s30 }
 0x57c   : > { %s2731_s30 = smov %s2118_s15  ;;  %s2732_s15 = smov %s2397_s14 }
 0x57d   : > { %s2733_s16 = smov %s2385_s1  ;;  %36 = sbr.rel (!%p34_p12) target bundleno = 22 (0x16), region = 168 }
 0x584   :  { %1290 = vsyncpa [#allocation3], 1 }
 0x585   :  { %1292 = vsyncpa [#allocation3 + $0x1], 1 }
 0x586   :  { %1293 = vsyncpa [#allocation6], 1 }
 0x587   :  { %1294 = vsyncpa [#allocation9], 1 }
 0x588   :  { %1295 = vsyncpa [#allocation12], 1 }
 0x589   :  { %1296 = vsyncpa [#allocation4], 1 }
 0x58a   :  { %1298 = vsyncpa [#allocation4 + $0x1], 1 }
 0x58b   :  { %1299 = vsyncpa [#allocation15], 1 }
 0x58c   :  { %1301 = vsyncpa [#allocation15 + $0x1], 1 }

</bundles_post_ra>
